<compile_context>
chip_gen: v5e
topology: v5e:2x2
jax: 0.10.0
libtpu: 0.0.40
codegen_flags: <defaults>
</compile_context>

<pallas_src>
import math
from functools import partial

import jax
import jax.numpy as jnp
from jax.experimental import pallas as pl
from jax.experimental.pallas import tpu as pltpu


def _patchify_kernel_lane_dense(x_ref, o_ref, *, C, p, GW, k):
    """Relayout k patch-rows of one image into lane-dense flattened patches.

    x_ref: (1, C, k*p, W)   -- k patch-rows of one image, W = GW * p
    o_ref: (1, k*GW, C*p*p) -- one lane-dense row per patch, row-major (c, i, j)
    """
    # TODO(synk): for very large GH/GW these Python loops unroll a lot of code;
    # switch the inner patch loop to lax.fori_loop(..., unroll=True) if needed.
    for r in range(k):                                  # local patch-row index
        # pieces[gw] collects the C*p lane segments of patch (r, gw) in
        # row-major (c, i) order; each segment is p contiguous lanes.
        pieces = [[] for _ in range(GW)]
        for c in range(C):
            for i in range(p):
                row = x_ref[0, c, pl.ds(r * p + i, 1), :]          # (1, W) full-lane load
                for gw in range(GW):
                    pieces[gw].append(row[:, gw * p:(gw + 1) * p])  # (1, p)
        for gw in range(GW):
            # Single lane-dense (1, C*p*p) row per patch: the shuffle runs on
            # the XLU instead of emitting GW masked p-lane stores.
            flat = jnp.concatenate(pieces[gw], axis=1)              # (1, C*p*p)
            o_ref[0, pl.ds(r * GW + gw, 1), :] = flat


def _patchify_kernel_blocked(x_ref, o_ref, *, C, p, GW, k):
    """Safety-net kernel (plain block copies only): same blocking, (C,p,p) stores."""
    for r in range(k):
        for gw in range(GW):
            o_ref[0, r * GW + gw] = x_ref[0, :, pl.ds(r * p, p), pl.ds(gw * p, p)]


def _pick_rows_per_step(GH, GW, C, p, W, itemsize, budget_bytes):
    """Largest number of patch-rows per grid step whose blocks fit the budget."""
    def block_bytes(k):
        # double-buffered input strip + lane-dense output block (logical bytes)
        return 2 * (C * k * p * W + k * GW * C * p * p) * itemsize

    if block_bytes(GH) <= budget_bytes:
        return GH                              # whole image per step (full dims: always legal)
    granule = max(8, 32 // itemsize)           # sublane packing granule: f32->8, bf16->16, i8->32
    best = GH
    for k in range(GH - 1, 0, -1):
        if GH % k:
            continue
        # Sub-image blocks must keep second-to-last block dims tiling-legal.
        if (k * p) % granule or (k * GW) % granule:
            continue
        best = k
        if block_bytes(k) <= budget_bytes:
            return k
    return best


def _call_patchify(x, p, k, *, lane_dense):
    B, C, H, W = x.shape
    GH, GW = H // p, W // p
    N = GH * GW
    itemsize = jnp.dtype(x.dtype).itemsize
    common = dict(
        compiler_params=pltpu.CompilerParams(
            dimension_semantics=("parallel", "parallel"),
            vmem_limit_bytes=32 * 1024 * 1024),
        cost_estimate=pl.CostEstimate(
            flops=0, transcendentals=0, bytes_accessed=2 * x.size * itemsize),
    )
    in_specs = [pl.BlockSpec((1, C, k * p, W), lambda b, g: (b, 0, g, 0))]

    if lane_dense:
        out_flat = pl.pallas_call(
            partial(_patchify_kernel_lane_dense, C=C, p=p, GW=GW, k=k),
            out_shape=jax.ShapeDtypeStruct((B, N, C * p * p), x.dtype),
            grid_spec=pltpu.PrefetchScalarGridSpec(
                num_scalar_prefetch=0,
                grid=(B, GH // k),
                in_specs=in_specs,
                out_specs=pl.BlockSpec((1, k * GW, C * p * p),
                                       lambda b, g: (b, g, 0)),
            ),
            **common,
        )(x)
        # Free row-major reshape back to the module's output layout.
        return out_flat.reshape(B, N, C, p, p)

    return pl.pallas_call(
        partial(_patchify_kernel_blocked, C=C, p=p, GW=GW, k=k),
        out_shape=jax.ShapeDtypeStruct((B, N, C, p, p), x.dtype),
        grid_spec=pltpu.PrefetchScalarGridSpec(
            num_scalar_prefetch=0,
            grid=(B, GH // k),
            in_specs=in_specs,
            out_specs=pl.BlockSpec((1, k * GW, C, p, p),
                                   lambda b, g: (b, g, 0, 0, 0)),
        ),
        **common,
    )(x)


def simple_patchifier(x, patch_size, *, vmem_budget_bytes=8 * 1024 * 1024):
    """Pallas TPU implementation of SimplePatchifier.forward (NCHW input)."""
    B, C, H, W = x.shape
    p = patch_size
    assert H % p == 0 and W % p == 0, "H and W must be divisible by patch_size"
    GH, GW = H // p, W // p
    itemsize = jnp.dtype(x.dtype).itemsize
    k = _pick_rows_per_step(GH, GW, C, p, W, itemsize, vmem_budget_bytes)
    try:
        return jax.block_until_ready(_call_patchify(x, p, k, lane_dense=True))
    except Exception:
        # Safety net in case this Mosaic build lacks unaligned lane
        # concatenation: identical grid/blocking, plain (C, p, p) block copies.
        return jax.block_until_ready(_call_patchify(x, p, k, lane_dense=False))


def _reference_patchifier(x, patch_size):
    # Pure-JAX reference reproducing the torch permute/unfold/unfold/view semantics.
    B, C, H, W = x.shape
    p = patch_size
    GH, GW = H // p, W // p
    y = x.reshape(B, C, GH, p, GW, p)
    y = jnp.transpose(y, (0, 2, 4, 1, 3, 5))  # (B, GH, GW, C, p, p)
    return y.reshape(B, GH * GW, C, p, p)


if __name__ == "__main__":
    # Small shapes consistent with the module's forward (patch_size shrunk so
    # H, W stay small): B=2, C=4, H=W=16, patch_size=8 -> 4 patches per image.
    B, C, H, W = 2, 4, 16, 16
    patch_size = 8

    key = jax.random.PRNGKey(0)
    x = jax.random.normal(key, (B, C, H, W), dtype=jnp.float32)

    out = simple_patchifier(x, patch_size)
    out = jax.block_until_ready(out)

    expected = _reference_patchifier(x, patch_size)
    assert out.shape == (B, (H // patch_size) * (W // patch_size), C,
                         patch_size, patch_size), out.shape
    assert out.dtype == x.dtype
    assert jnp.array_equal(out, expected), "Pallas output mismatch vs reference"

    print("KERNEL_OK")
</pallas_src>

<mosaic_0001>
module attributes {stable_mosaic.version = 11 : i64} {
  func.func @_patchify_kernel_lane_dense(%arg0: i32, %arg1: i32, %arg2: memref<1x4x16x16xf32, #tpu.memory_space<vmem>>, %arg3: memref<1x4x256xf32, #tpu.memory_space<vmem>>) attributes {dimension_semantics = [#tpu.dimension_semantics<parallel>, #tpu.dimension_semantics<parallel>], iteration_bounds = array<i64: 2, 1>, scalar_prefetch = 0 : i64, scratch_operands = 0 : i64, tpu.core_type = #tpu.core_type<tc>, window_params = [{transform_indices = @transform_0, window_bounds = array<i64: 1, 4, 16, 16>}, {transform_indices = @transform_1, window_bounds = array<i64: 1, 4, 256>}]} {
    %c0 = arith.constant 0 : index
    %c0_0 = arith.constant 0 : index
    %c0_1 = arith.constant 0 : index
    %c0_2 = arith.constant 0 : index
    %0 = vector.load %arg2[%c0, %c0_0, %c0_1, %c0_2] : memref<1x4x16x16xf32, #tpu.memory_space<vmem>>, vector<1x1x1x16xf32>
    %1 = vector.shape_cast %0 : vector<1x1x1x16xf32> to vector<1x16xf32>
    %2 = vector.extract_strided_slice %1 {offsets = [0, 0], sizes = [1, 8], strides = [1, 1]} : vector<1x16xf32> to vector<1x8xf32>
    %3 = vector.extract_strided_slice %1 {offsets = [0, 8], sizes = [1, 8], strides = [1, 1]} : vector<1x16xf32> to vector<1x8xf32>
    %c0_3 = arith.constant 0 : index
    %c0_4 = arith.constant 0 : index
    %c1 = arith.constant 1 : index
    %c0_5 = arith.constant 0 : index
    %4 = vector.load %arg2[%c0_3, %c0_4, %c1, %c0_5] : memref<1x4x16x16xf32, #tpu.memory_space<vmem>>, vector<1x1x1x16xf32>
    %5 = vector.shape_cast %4 : vector<1x1x1x16xf32> to vector<1x16xf32>
    %6 = vector.extract_strided_slice %5 {offsets = [0, 0], sizes = [1, 8], strides = [1, 1]} : vector<1x16xf32> to vector<1x8xf32>
    %7 = vector.extract_strided_slice %5 {offsets = [0, 8], sizes = [1, 8], strides = [1, 1]} : vector<1x16xf32> to vector<1x8xf32>
    %c0_6 = arith.constant 0 : index
    %c0_7 = arith.constant 0 : index
    %c2 = arith.constant 2 : index
    %c0_8 = arith.constant 0 : index
    %8 = vector.load %arg2[%c0_6, %c0_7, %c2, %c0_8] : memref<1x4x16x16xf32, #tpu.memory_space<vmem>>, vector<1x1x1x16xf32>
    %9 = vector.shape_cast %8 : vector<1x1x1x16xf32> to vector<1x16xf32>
    %10 = vector.extract_strided_slice %9 {offsets = [0, 0], sizes = [1, 8], strides = [1, 1]} : vector<1x16xf32> to vector<1x8xf32>
    %11 = vector.extract_strided_slice %9 {offsets = [0, 8], sizes = [1, 8], strides = [1, 1]} : vector<1x16xf32> to vector<1x8xf32>
    %c0_9 = arith.constant 0 : index
    %c0_10 = arith.constant 0 : index
    %c3 = arith.constant 3 : index
    %c0_11 = arith.constant 0 : index
    %12 = vector.load %arg2[%c0_9, %c0_10, %c3, %c0_11] : memref<1x4x16x16xf32, #tpu.memory_space<vmem>>, vector<1x1x1x16xf32>
    %13 = vector.shape_cast %12 : vector<1x1x1x16xf32> to vector<1x16xf32>
    %14 = vector.extract_strided_slice %13 {offsets = [0, 0], sizes = [1, 8], strides = [1, 1]} : vector<1x16xf32> to vector<1x8xf32>
    %15 = vector.extract_strided_slice %13 {offsets = [0, 8], sizes = [1, 8], strides = [1, 1]} : vector<1x16xf32> to vector<1x8xf32>
    %c0_12 = arith.constant 0 : index
    %c0_13 = arith.constant 0 : index
    %c4 = arith.constant 4 : index
    %c0_14 = arith.constant 0 : index
    %16 = vector.load %arg2[%c0_12, %c0_13, %c4, %c0_14] : memref<1x4x16x16xf32, #tpu.memory_space<vmem>>, vector<1x1x1x16xf32>
    %17 = vector.shape_cast %16 : vector<1x1x1x16xf32> to vector<1x16xf32>
    %18 = vector.extract_strided_slice %17 {offsets = [0, 0], sizes = [1, 8], strides = [1, 1]} : vector<1x16xf32> to vector<1x8xf32>
    %19 = vector.extract_strided_slice %17 {offsets = [0, 8], sizes = [1, 8], strides = [1, 1]} : vector<1x16xf32> to vector<1x8xf32>
    %c0_15 = arith.constant 0 : index
    %c0_16 = arith.constant 0 : index
    %c5 = arith.constant 5 : index
    %c0_17 = arith.constant 0 : index
    %20 = vector.load %arg2[%c0_15, %c0_16, %c5, %c0_17] : memref<1x4x16x16xf32, #tpu.memory_space<vmem>>, vector<1x1x1x16xf32>
    %21 = vector.shape_cast %20 : vector<1x1x1x16xf32> to vector<1x16xf32>
    %22 = vector.extract_strided_slice %21 {offsets = [0, 0], sizes = [1, 8], strides = [1, 1]} : vector<1x16xf32> to vector<1x8xf32>
    %23 = vector.extract_strided_slice %21 {offsets = [0, 8], sizes = [1, 8], strides = [1, 1]} : vector<1x16xf32> to vector<1x8xf32>
    %c0_18 = arith.constant 0 : index
    %c0_19 = arith.constant 0 : index
    %c6 = arith.constant 6 : index
    %c0_20 = arith.constant 0 : index
    %24 = vector.load %arg2[%c0_18, %c0_19, %c6, %c0_20] : memref<1x4x16x16xf32, #tpu.memory_space<vmem>>, vector<1x1x1x16xf32>
    %25 = vector.shape_cast %24 : vector<1x1x1x16xf32> to vector<1x16xf32>
    %26 = vector.extract_strided_slice %25 {offsets = [0, 0], sizes = [1, 8], strides = [1, 1]} : vector<1x16xf32> to vector<1x8xf32>
    %27 = vector.extract_strided_slice %25 {offsets = [0, 8], sizes = [1, 8], strides = [1, 1]} : vector<1x16xf32> to vector<1x8xf32>
    %c0_21 = arith.constant 0 : index
    %c0_22 = arith.constant 0 : index
    %c7 = arith.constant 7 : index
    %c0_23 = arith.constant 0 : index
    %28 = vector.load %arg2[%c0_21, %c0_22, %c7, %c0_23] : memref<1x4x16x16xf32, #tpu.memory_space<vmem>>, vector<1x1x1x16xf32>
    %29 = vector.shape_cast %28 : vector<1x1x1x16xf32> to vector<1x16xf32>
    %30 = vector.extract_strided_slice %29 {offsets = [0, 0], sizes = [1, 8], strides = [1, 1]} : vector<1x16xf32> to vector<1x8xf32>
    %31 = vector.extract_strided_slice %29 {offsets = [0, 8], sizes = [1, 8], strides = [1, 1]} : vector<1x16xf32> to vector<1x8xf32>
    %c0_24 = arith.constant 0 : index
    %c1_25 = arith.constant 1 : index
    %c0_26 = arith.constant 0 : index
    %c0_27 = arith.constant 0 : index
    %32 = vector.load %arg2[%c0_24, %c1_25, %c0_26, %c0_27] : memref<1x4x16x16xf32, #tpu.memory_space<vmem>>, vector<1x1x1x16xf32>
    %33 = vector.shape_cast %32 : vector<1x1x1x16xf32> to vector<1x16xf32>
    %34 = vector.extract_strided_slice %33 {offsets = [0, 0], sizes = [1, 8], strides = [1, 1]} : vector<1x16xf32> to vector<1x8xf32>
    %35 = vector.extract_strided_slice %33 {offsets = [0, 8], sizes = [1, 8], strides = [1, 1]} : vector<1x16xf32> to vector<1x8xf32>
    %c0_28 = arith.constant 0 : index
    %c1_29 = arith.constant 1 : index
    %c1_30 = arith.constant 1 : index
    %c0_31 = arith.constant 0 : index
    %36 = vector.load %arg2[%c0_28, %c1_29, %c1_30, %c0_31] : memref<1x4x16x16xf32, #tpu.memory_space<vmem>>, vector<1x1x1x16xf32>
    %37 = vector.shape_cast %36 : vector<1x1x1x16xf32> to vector<1x16xf32>
    %38 = vector.extract_strided_slice %37 {offsets = [0, 0], sizes = [1, 8], strides = [1, 1]} : vector<1x16xf32> to vector<1x8xf32>
    %39 = vector.extract_strided_slice %37 {offsets = [0, 8], sizes = [1, 8], strides = [1, 1]} : vector<1x16xf32> to vector<1x8xf32>
    %c0_32 = arith.constant 0 : index
    %c1_33 = arith.constant 1 : index
    %c2_34 = arith.constant 2 : index
    %c0_35 = arith.constant 0 : index
    %40 = vector.load %arg2[%c0_32, %c1_33, %c2_34, %c0_35] : memref<1x4x16x16xf32, #tpu.memory_space<vmem>>, vector<1x1x1x16xf32>
    %41 = vector.shape_cast %40 : vector<1x1x1x16xf32> to vector<1x16xf32>
    %42 = vector.extract_strided_slice %41 {offsets = [0, 0], sizes = [1, 8], strides = [1, 1]} : vector<1x16xf32> to vector<1x8xf32>
    %43 = vector.extract_strided_slice %41 {offsets = [0, 8], sizes = [1, 8], strides = [1, 1]} : vector<1x16xf32> to vector<1x8xf32>
    %c0_36 = arith.constant 0 : index
    %c1_37 = arith.constant 1 : index
    %c3_38 = arith.constant 3 : index
    %c0_39 = arith.constant 0 : index
    %44 = vector.load %arg2[%c0_36, %c1_37, %c3_38, %c0_39] : memref<1x4x16x16xf32, #tpu.memory_space<vmem>>, vector<1x1x1x16xf32>
    %45 = vector.shape_cast %44 : vector<1x1x1x16xf32> to vector<1x16xf32>
    %46 = vector.extract_strided_slice %45 {offsets = [0, 0], sizes = [1, 8], strides = [1, 1]} : vector<1x16xf32> to vector<1x8xf32>
    %47 = vector.extract_strided_slice %45 {offsets = [0, 8], sizes = [1, 8], strides = [1, 1]} : vector<1x16xf32> to vector<1x8xf32>
    %c0_40 = arith.constant 0 : index
    %c1_41 = arith.constant 1 : index
    %c4_42 = arith.constant 4 : index
    %c0_43 = arith.constant 0 : index
    %48 = vector.load %arg2[%c0_40, %c1_41, %c4_42, %c0_43] : memref<1x4x16x16xf32, #tpu.memory_space<vmem>>, vector<1x1x1x16xf32>
    %49 = vector.shape_cast %48 : vector<1x1x1x16xf32> to vector<1x16xf32>
    %50 = vector.extract_strided_slice %49 {offsets = [0, 0], sizes = [1, 8], strides = [1, 1]} : vector<1x16xf32> to vector<1x8xf32>
    %51 = vector.extract_strided_slice %49 {offsets = [0, 8], sizes = [1, 8], strides = [1, 1]} : vector<1x16xf32> to vector<1x8xf32>
    %c0_44 = arith.constant 0 : index
    %c1_45 = arith.constant 1 : index
    %c5_46 = arith.constant 5 : index
    %c0_47 = arith.constant 0 : index
    %52 = vector.load %arg2[%c0_44, %c1_45, %c5_46, %c0_47] : memref<1x4x16x16xf32, #tpu.memory_space<vmem>>, vector<1x1x1x16xf32>
    %53 = vector.shape_cast %52 : vector<1x1x1x16xf32> to vector<1x16xf32>
    %54 = vector.extract_strided_slice %53 {offsets = [0, 0], sizes = [1, 8], strides = [1, 1]} : vector<1x16xf32> to vector<1x8xf32>
    %55 = vector.extract_strided_slice %53 {offsets = [0, 8], sizes = [1, 8], strides = [1, 1]} : vector<1x16xf32> to vector<1x8xf32>
    %c0_48 = arith.constant 0 : index
    %c1_49 = arith.constant 1 : index
    %c6_50 = arith.constant 6 : index
    %c0_51 = arith.constant 0 : index
    %56 = vector.load %arg2[%c0_48, %c1_49, %c6_50, %c0_51] : memref<1x4x16x16xf32, #tpu.memory_space<vmem>>, vector<1x1x1x16xf32>
    %57 = vector.shape_cast %56 : vector<1x1x1x16xf32> to vector<1x16xf32>
    %58 = vector.extract_strided_slice %57 {offsets = [0, 0], sizes = [1, 8], strides = [1, 1]} : vector<1x16xf32> to vector<1x8xf32>
    %59 = vector.extract_strided_slice %57 {offsets = [0, 8], sizes = [1, 8], strides = [1, 1]} : vector<1x16xf32> to vector<1x8xf32>
    %c0_52 = arith.constant 0 : index
    %c1_53 = arith.constant 1 : index
    %c7_54 = arith.constant 7 : index
    %c0_55 = arith.constant 0 : index
    %60 = vector.load %arg2[%c0_52, %c1_53, %c7_54, %c0_55] : memref<1x4x16x16xf32, #tpu.memory_space<vmem>>, vector<1x1x1x16xf32>
    %61 = vector.shape_cast %60 : vector<1x1x1x16xf32> to vector<1x16xf32>
    %62 = vector.extract_strided_slice %61 {offsets = [0, 0], sizes = [1, 8], strides = [1, 1]} : vector<1x16xf32> to vector<1x8xf32>
    %63 = vector.extract_strided_slice %61 {offsets = [0, 8], sizes = [1, 8], strides = [1, 1]} : vector<1x16xf32> to vector<1x8xf32>
    %c0_56 = arith.constant 0 : index
    %c2_57 = arith.constant 2 : index
    %c0_58 = arith.constant 0 : index
    %c0_59 = arith.constant 0 : index
    %64 = vector.load %arg2[%c0_56, %c2_57, %c0_58, %c0_59] : memref<1x4x16x16xf32, #tpu.memory_space<vmem>>, vector<1x1x1x16xf32>
    %65 = vector.shape_cast %64 : vector<1x1x1x16xf32> to vector<1x16xf32>
    %66 = vector.extract_strided_slice %65 {offsets = [0, 0], sizes = [1, 8], strides = [1, 1]} : vector<1x16xf32> to vector<1x8xf32>
    %67 = vector.extract_strided_slice %65 {offsets = [0, 8], sizes = [1, 8], strides = [1, 1]} : vector<1x16xf32> to vector<1x8xf32>
    %c0_60 = arith.constant 0 : index
    %c2_61 = arith.constant 2 : index
    %c1_62 = arith.constant 1 : index
    %c0_63 = arith.constant 0 : index
    %68 = vector.load %arg2[%c0_60, %c2_61, %c1_62, %c0_63] : memref<1x4x16x16xf32, #tpu.memory_space<vmem>>, vector<1x1x1x16xf32>
    %69 = vector.shape_cast %68 : vector<1x1x1x16xf32> to vector<1x16xf32>
    %70 = vector.extract_strided_slice %69 {offsets = [0, 0], sizes = [1, 8], strides = [1, 1]} : vector<1x16xf32> to vector<1x8xf32>
    %71 = vector.extract_strided_slice %69 {offsets = [0, 8], sizes = [1, 8], strides = [1, 1]} : vector<1x16xf32> to vector<1x8xf32>
    %c0_64 = arith.constant 0 : index
    %c2_65 = arith.constant 2 : index
    %c2_66 = arith.constant 2 : index
    %c0_67 = arith.constant 0 : index
    %72 = vector.load %arg2[%c0_64, %c2_65, %c2_66, %c0_67] : memref<1x4x16x16xf32, #tpu.memory_space<vmem>>, vector<1x1x1x16xf32>
    %73 = vector.shape_cast %72 : vector<1x1x1x16xf32> to vector<1x16xf32>
    %74 = vector.extract_strided_slice %73 {offsets = [0, 0], sizes = [1, 8], strides = [1, 1]} : vector<1x16xf32> to vector<1x8xf32>
    %75 = vector.extract_strided_slice %73 {offsets = [0, 8], sizes = [1, 8], strides = [1, 1]} : vector<1x16xf32> to vector<1x8xf32>
    %c0_68 = arith.constant 0 : index
    %c2_69 = arith.constant 2 : index
    %c3_70 = arith.constant 3 : index
    %c0_71 = arith.constant 0 : index
    %76 = vector.load %arg2[%c0_68, %c2_69, %c3_70, %c0_71] : memref<1x4x16x16xf32, #tpu.memory_space<vmem>>, vector<1x1x1x16xf32>
    %77 = vector.shape_cast %76 : vector<1x1x1x16xf32> to vector<1x16xf32>
    %78 = vector.extract_strided_slice %77 {offsets = [0, 0], sizes = [1, 8], strides = [1, 1]} : vector<1x16xf32> to vector<1x8xf32>
    %79 = vector.extract_strided_slice %77 {offsets = [0, 8], sizes = [1, 8], strides = [1, 1]} : vector<1x16xf32> to vector<1x8xf32>
    %c0_72 = arith.constant 0 : index
    %c2_73 = arith.constant 2 : index
    %c4_74 = arith.constant 4 : index
    %c0_75 = arith.constant 0 : index
    %80 = vector.load %arg2[%c0_72, %c2_73, %c4_74, %c0_75] : memref<1x4x16x16xf32, #tpu.memory_space<vmem>>, vector<1x1x1x16xf32>
    %81 = vector.shape_cast %80 : vector<1x1x1x16xf32> to vector<1x16xf32>
    %82 = vector.extract_strided_slice %81 {offsets = [0, 0], sizes = [1, 8], strides = [1, 1]} : vector<1x16xf32> to vector<1x8xf32>
    %83 = vector.extract_strided_slice %81 {offsets = [0, 8], sizes = [1, 8], strides = [1, 1]} : vector<1x16xf32> to vector<1x8xf32>
    %c0_76 = arith.constant 0 : index
    %c2_77 = arith.constant 2 : index
    %c5_78 = arith.constant 5 : index
    %c0_79 = arith.constant 0 : index
    %84 = vector.load %arg2[%c0_76, %c2_77, %c5_78, %c0_79] : memref<1x4x16x16xf32, #tpu.memory_space<vmem>>, vector<1x1x1x16xf32>
    %85 = vector.shape_cast %84 : vector<1x1x1x16xf32> to vector<1x16xf32>
    %86 = vector.extract_strided_slice %85 {offsets = [0, 0], sizes = [1, 8], strides = [1, 1]} : vector<1x16xf32> to vector<1x8xf32>
    %87 = vector.extract_strided_slice %85 {offsets = [0, 8], sizes = [1, 8], strides = [1, 1]} : vector<1x16xf32> to vector<1x8xf32>
    %c0_80 = arith.constant 0 : index
    %c2_81 = arith.constant 2 : index
    %c6_82 = arith.constant 6 : index
    %c0_83 = arith.constant 0 : index
    %88 = vector.load %arg2[%c0_80, %c2_81, %c6_82, %c0_83] : memref<1x4x16x16xf32, #tpu.memory_space<vmem>>, vector<1x1x1x16xf32>
    %89 = vector.shape_cast %88 : vector<1x1x1x16xf32> to vector<1x16xf32>
    %90 = vector.extract_strided_slice %89 {offsets = [0, 0], sizes = [1, 8], strides = [1, 1]} : vector<1x16xf32> to vector<1x8xf32>
    %91 = vector.extract_strided_slice %89 {offsets = [0, 8], sizes = [1, 8], strides = [1, 1]} : vector<1x16xf32> to vector<1x8xf32>
    %c0_84 = arith.constant 0 : index
    %c2_85 = arith.constant 2 : index
    %c7_86 = arith.constant 7 : index
    %c0_87 = arith.constant 0 : index
    %92 = vector.load %arg2[%c0_84, %c2_85, %c7_86, %c0_87] : memref<1x4x16x16xf32, #tpu.memory_space<vmem>>, vector<1x1x1x16xf32>
    %93 = vector.shape_cast %92 : vector<1x1x1x16xf32> to vector<1x16xf32>
    %94 = vector.extract_strided_slice %93 {offsets = [0, 0], sizes = [1, 8], strides = [1, 1]} : vector<1x16xf32> to vector<1x8xf32>
    %95 = vector.extract_strided_slice %93 {offsets = [0, 8], sizes = [1, 8], strides = [1, 1]} : vector<1x16xf32> to vector<1x8xf32>
    %c0_88 = arith.constant 0 : index
    %c3_89 = arith.constant 3 : index
    %c0_90 = arith.constant 0 : index
    %c0_91 = arith.constant 0 : index
    %96 = vector.load %arg2[%c0_88, %c3_89, %c0_90, %c0_91] : memref<1x4x16x16xf32, #tpu.memory_space<vmem>>, vector<1x1x1x16xf32>
    %97 = vector.shape_cast %96 : vector<1x1x1x16xf32> to vector<1x16xf32>
    %98 = vector.extract_strided_slice %97 {offsets = [0, 0], sizes = [1, 8], strides = [1, 1]} : vector<1x16xf32> to vector<1x8xf32>
    %99 = vector.extract_strided_slice %97 {offsets = [0, 8], sizes = [1, 8], strides = [1, 1]} : vector<1x16xf32> to vector<1x8xf32>
    %c0_92 = arith.constant 0 : index
    %c3_93 = arith.constant 3 : index
    %c1_94 = arith.constant 1 : index
    %c0_95 = arith.constant 0 : index
    %100 = vector.load %arg2[%c0_92, %c3_93, %c1_94, %c0_95] : memref<1x4x16x16xf32, #tpu.memory_space<vmem>>, vector<1x1x1x16xf32>
    %101 = vector.shape_cast %100 : vector<1x1x1x16xf32> to vector<1x16xf32>
    %102 = vector.extract_strided_slice %101 {offsets = [0, 0], sizes = [1, 8], strides = [1, 1]} : vector<1x16xf32> to vector<1x8xf32>
    %103 = vector.extract_strided_slice %101 {offsets = [0, 8], sizes = [1, 8], strides = [1, 1]} : vector<1x16xf32> to vector<1x8xf32>
    %c0_96 = arith.constant 0 : index
    %c3_97 = arith.constant 3 : index
    %c2_98 = arith.constant 2 : index
    %c0_99 = arith.constant 0 : index
    %104 = vector.load %arg2[%c0_96, %c3_97, %c2_98, %c0_99] : memref<1x4x16x16xf32, #tpu.memory_space<vmem>>, vector<1x1x1x16xf32>
    %105 = vector.shape_cast %104 : vector<1x1x1x16xf32> to vector<1x16xf32>
    %106 = vector.extract_strided_slice %105 {offsets = [0, 0], sizes = [1, 8], strides = [1, 1]} : vector<1x16xf32> to vector<1x8xf32>
    %107 = vector.extract_strided_slice %105 {offsets = [0, 8], sizes = [1, 8], strides = [1, 1]} : vector<1x16xf32> to vector<1x8xf32>
    %c0_100 = arith.constant 0 : index
    %c3_101 = arith.constant 3 : index
    %c3_102 = arith.constant 3 : index
    %c0_103 = arith.constant 0 : index
    %108 = vector.load %arg2[%c0_100, %c3_101, %c3_102, %c0_103] : memref<1x4x16x16xf32, #tpu.memory_space<vmem>>, vector<1x1x1x16xf32>
    %109 = vector.shape_cast %108 : vector<1x1x1x16xf32> to vector<1x16xf32>
    %110 = vector.extract_strided_slice %109 {offsets = [0, 0], sizes = [1, 8], strides = [1, 1]} : vector<1x16xf32> to vector<1x8xf32>
    %111 = vector.extract_strided_slice %109 {offsets = [0, 8], sizes = [1, 8], strides = [1, 1]} : vector<1x16xf32> to vector<1x8xf32>
    %c0_104 = arith.constant 0 : index
    %c3_105 = arith.constant 3 : index
    %c4_106 = arith.constant 4 : index
    %c0_107 = arith.constant 0 : index
    %112 = vector.load %arg2[%c0_104, %c3_105, %c4_106, %c0_107] : memref<1x4x16x16xf32, #tpu.memory_space<vmem>>, vector<1x1x1x16xf32>
    %113 = vector.shape_cast %112 : vector<1x1x1x16xf32> to vector<1x16xf32>
    %114 = vector.extract_strided_slice %113 {offsets = [0, 0], sizes = [1, 8], strides = [1, 1]} : vector<1x16xf32> to vector<1x8xf32>
    %115 = vector.extract_strided_slice %113 {offsets = [0, 8], sizes = [1, 8], strides = [1, 1]} : vector<1x16xf32> to vector<1x8xf32>
    %c0_108 = arith.constant 0 : index
    %c3_109 = arith.constant 3 : index
    %c5_110 = arith.constant 5 : index
    %c0_111 = arith.constant 0 : index
    %116 = vector.load %arg2[%c0_108, %c3_109, %c5_110, %c0_111] : memref<1x4x16x16xf32, #tpu.memory_space<vmem>>, vector<1x1x1x16xf32>
    %117 = vector.shape_cast %116 : vector<1x1x1x16xf32> to vector<1x16xf32>
    %118 = vector.extract_strided_slice %117 {offsets = [0, 0], sizes = [1, 8], strides = [1, 1]} : vector<1x16xf32> to vector<1x8xf32>
    %119 = vector.extract_strided_slice %117 {offsets = [0, 8], sizes = [1, 8], strides = [1, 1]} : vector<1x16xf32> to vector<1x8xf32>
    %c0_112 = arith.constant 0 : index
    %c3_113 = arith.constant 3 : index
    %c6_114 = arith.constant 6 : index
    %c0_115 = arith.constant 0 : index
    %120 = vector.load %arg2[%c0_112, %c3_113, %c6_114, %c0_115] : memref<1x4x16x16xf32, #tpu.memory_space<vmem>>, vector<1x1x1x16xf32>
    %121 = vector.shape_cast %120 : vector<1x1x1x16xf32> to vector<1x16xf32>
    %122 = vector.extract_strided_slice %121 {offsets = [0, 0], sizes = [1, 8], strides = [1, 1]} : vector<1x16xf32> to vector<1x8xf32>
    %123 = vector.extract_strided_slice %121 {offsets = [0, 8], sizes = [1, 8], strides = [1, 1]} : vector<1x16xf32> to vector<1x8xf32>
    %c0_116 = arith.constant 0 : index
    %c3_117 = arith.constant 3 : index
    %c7_118 = arith.constant 7 : index
    %c0_119 = arith.constant 0 : index
    %124 = vector.load %arg2[%c0_116, %c3_117, %c7_118, %c0_119] : memref<1x4x16x16xf32, #tpu.memory_space<vmem>>, vector<1x1x1x16xf32>
    %125 = vector.shape_cast %124 : vector<1x1x1x16xf32> to vector<1x16xf32>
    %126 = vector.extract_strided_slice %125 {offsets = [0, 0], sizes = [1, 8], strides = [1, 1]} : vector<1x16xf32> to vector<1x8xf32>
    %127 = vector.extract_strided_slice %125 {offsets = [0, 8], sizes = [1, 8], strides = [1, 1]} : vector<1x16xf32> to vector<1x8xf32>
    %128 = tpu.concatenate %2, %6, %10, %14, %18, %22, %26, %30, %34, %38, %42, %46, %50, %54, %58, %62 in 1 : vector<1x8xf32>, vector<1x8xf32>, vector<1x8xf32>, vector<1x8xf32>, vector<1x8xf32>, vector<1x8xf32>, vector<1x8xf32>, vector<1x8xf32>, vector<1x8xf32>, vector<1x8xf32>, vector<1x8xf32>, vector<1x8xf32>, vector<1x8xf32>, vector<1x8xf32>, vector<1x8xf32>, vector<1x8xf32> -> vector<1x128xf32>
    %129 = tpu.concatenate %66, %70, %74, %78, %82, %86, %90, %94, %98, %102, %106, %110, %114, %118, %122, %126 in 1 : vector<1x8xf32>, vector<1x8xf32>, vector<1x8xf32>, vector<1x8xf32>, vector<1x8xf32>, vector<1x8xf32>, vector<1x8xf32>, vector<1x8xf32>, vector<1x8xf32>, vector<1x8xf32>, vector<1x8xf32>, vector<1x8xf32>, vector<1x8xf32>, vector<1x8xf32>, vector<1x8xf32>, vector<1x8xf32> -> vector<1x128xf32>
    %130 = tpu.concatenate %128, %129 in 1 : vector<1x128xf32>, vector<1x128xf32> -> vector<1x256xf32>
    %c0_120 = arith.constant 0 : index
    %c0_121 = arith.constant 0 : index
    %c0_122 = arith.constant 0 : index
    %131 = vector.load %arg3[%c0_120, %c0_121, %c0_122] : memref<1x4x256xf32, #tpu.memory_space<vmem>>, vector<1x1x256xf32>
    %132 = vector.shape_cast %131 : vector<1x1x256xf32> to vector<1x256xf32>
    %133 = vector.shape_cast %130 : vector<1x256xf32> to vector<1x1x256xf32>
    tpu.vector_store %arg3[%c0_120, %c0_121, %c0_122], %133 {strides = array<i32>} : memref<1x4x256xf32, #tpu.memory_space<vmem>>, vector<1x1x256xf32>,
    %134 = tpu.concatenate %3, %7, %11, %15, %19, %23, %27, %31, %35, %39, %43, %47, %51, %55, %59, %63 in 1 : vector<1x8xf32>, vector<1x8xf32>, vector<1x8xf32>, vector<1x8xf32>, vector<1x8xf32>, vector<1x8xf32>, vector<1x8xf32>, vector<1x8xf32>, vector<1x8xf32>, vector<1x8xf32>, vector<1x8xf32>, vector<1x8xf32>, vector<1x8xf32>, vector<1x8xf32>, vector<1x8xf32>, vector<1x8xf32> -> vector<1x128xf32>
    %135 = tpu.concatenate %67, %71, %75, %79, %83, %87, %91, %95, %99, %103, %107, %111, %115, %119, %123, %127 in 1 : vector<1x8xf32>, vector<1x8xf32>, vector<1x8xf32>, vector<1x8xf32>, vector<1x8xf32>, vector<1x8xf32>, vector<1x8xf32>, vector<1x8xf32>, vector<1x8xf32>, vector<1x8xf32>, vector<1x8xf32>, vector<1x8xf32>, vector<1x8xf32>, vector<1x8xf32>, vector<1x8xf32>, vector<1x8xf32> -> vector<1x128xf32>
    %136 = tpu.concatenate %134, %135 in 1 : vector<1x128xf32>, vector<1x128xf32> -> vector<1x256xf32>
    %c0_123 = arith.constant 0 : index
    %c1_124 = arith.constant 1 : index
    %c0_125 = arith.constant 0 : index
    %137 = vector.load %arg3[%c0_123, %c1_124, %c0_125] : memref<1x4x256xf32, #tpu.memory_space<vmem>>, vector<1x1x256xf32>
    %138 = vector.shape_cast %137 : vector<1x1x256xf32> to vector<1x256xf32>
    %139 = vector.shape_cast %136 : vector<1x256xf32> to vector<1x1x256xf32>
    tpu.vector_store %arg3[%c0_123, %c1_124, %c0_125], %139 {strides = array<i32>} : memref<1x4x256xf32, #tpu.memory_space<vmem>>, vector<1x1x256xf32>,
    %c0_126 = arith.constant 0 : index
    %c0_127 = arith.constant 0 : index
    %c8 = arith.constant 8 : index
    %c0_128 = arith.constant 0 : index
    %140 = vector.load %arg2[%c0_126, %c0_127, %c8, %c0_128] : memref<1x4x16x16xf32, #tpu.memory_space<vmem>>, vector<1x1x1x16xf32>
    %141 = vector.shape_cast %140 : vector<1x1x1x16xf32> to vector<1x16xf32>
    %142 = vector.extract_strided_slice %141 {offsets = [0, 0], sizes = [1, 8], strides = [1, 1]} : vector<1x16xf32> to vector<1x8xf32>
    %143 = vector.extract_strided_slice %141 {offsets = [0, 8], sizes = [1, 8], strides = [1, 1]} : vector<1x16xf32> to vector<1x8xf32>
    %c0_129 = arith.constant 0 : index
    %c0_130 = arith.constant 0 : index
    %c9 = arith.constant 9 : index
    %c0_131 = arith.constant 0 : index
    %144 = vector.load %arg2[%c0_129, %c0_130, %c9, %c0_131] : memref<1x4x16x16xf32, #tpu.memory_space<vmem>>, vector<1x1x1x16xf32>
    %145 = vector.shape_cast %144 : vector<1x1x1x16xf32> to vector<1x16xf32>
    %146 = vector.extract_strided_slice %145 {offsets = [0, 0], sizes = [1, 8], strides = [1, 1]} : vector<1x16xf32> to vector<1x8xf32>
    %147 = vector.extract_strided_slice %145 {offsets = [0, 8], sizes = [1, 8], strides = [1, 1]} : vector<1x16xf32> to vector<1x8xf32>
    %c0_132 = arith.constant 0 : index
    %c0_133 = arith.constant 0 : index
    %c10 = arith.constant 10 : index
    %c0_134 = arith.constant 0 : index
    %148 = vector.load %arg2[%c0_132, %c0_133, %c10, %c0_134] : memref<1x4x16x16xf32, #tpu.memory_space<vmem>>, vector<1x1x1x16xf32>
    %149 = vector.shape_cast %148 : vector<1x1x1x16xf32> to vector<1x16xf32>
    %150 = vector.extract_strided_slice %149 {offsets = [0, 0], sizes = [1, 8], strides = [1, 1]} : vector<1x16xf32> to vector<1x8xf32>
    %151 = vector.extract_strided_slice %149 {offsets = [0, 8], sizes = [1, 8], strides = [1, 1]} : vector<1x16xf32> to vector<1x8xf32>
    %c0_135 = arith.constant 0 : index
    %c0_136 = arith.constant 0 : index
    %c11 = arith.constant 11 : index
    %c0_137 = arith.constant 0 : index
    %152 = vector.load %arg2[%c0_135, %c0_136, %c11, %c0_137] : memref<1x4x16x16xf32, #tpu.memory_space<vmem>>, vector<1x1x1x16xf32>
    %153 = vector.shape_cast %152 : vector<1x1x1x16xf32> to vector<1x16xf32>
    %154 = vector.extract_strided_slice %153 {offsets = [0, 0], sizes = [1, 8], strides = [1, 1]} : vector<1x16xf32> to vector<1x8xf32>
    %155 = vector.extract_strided_slice %153 {offsets = [0, 8], sizes = [1, 8], strides = [1, 1]} : vector<1x16xf32> to vector<1x8xf32>
    %c0_138 = arith.constant 0 : index
    %c0_139 = arith.constant 0 : index
    %c12 = arith.constant 12 : index
    %c0_140 = arith.constant 0 : index
    %156 = vector.load %arg2[%c0_138, %c0_139, %c12, %c0_140] : memref<1x4x16x16xf32, #tpu.memory_space<vmem>>, vector<1x1x1x16xf32>
    %157 = vector.shape_cast %156 : vector<1x1x1x16xf32> to vector<1x16xf32>
    %158 = vector.extract_strided_slice %157 {offsets = [0, 0], sizes = [1, 8], strides = [1, 1]} : vector<1x16xf32> to vector<1x8xf32>
    %159 = vector.extract_strided_slice %157 {offsets = [0, 8], sizes = [1, 8], strides = [1, 1]} : vector<1x16xf32> to vector<1x8xf32>
    %c0_141 = arith.constant 0 : index
    %c0_142 = arith.constant 0 : index
    %c13 = arith.constant 13 : index
    %c0_143 = arith.constant 0 : index
    %160 = vector.load %arg2[%c0_141, %c0_142, %c13, %c0_143] : memref<1x4x16x16xf32, #tpu.memory_space<vmem>>, vector<1x1x1x16xf32>
    %161 = vector.shape_cast %160 : vector<1x1x1x16xf32> to vector<1x16xf32>
    %162 = vector.extract_strided_slice %161 {offsets = [0, 0], sizes = [1, 8], strides = [1, 1]} : vector<1x16xf32> to vector<1x8xf32>
    %163 = vector.extract_strided_slice %161 {offsets = [0, 8], sizes = [1, 8], strides = [1, 1]} : vector<1x16xf32> to vector<1x8xf32>
    %c0_144 = arith.constant 0 : index
    %c0_145 = arith.constant 0 : index
    %c14 = arith.constant 14 : index
    %c0_146 = arith.constant 0 : index
    %164 = vector.load %arg2[%c0_144, %c0_145, %c14, %c0_146] : memref<1x4x16x16xf32, #tpu.memory_space<vmem>>, vector<1x1x1x16xf32>
    %165 = vector.shape_cast %164 : vector<1x1x1x16xf32> to vector<1x16xf32>
    %166 = vector.extract_strided_slice %165 {offsets = [0, 0], sizes = [1, 8], strides = [1, 1]} : vector<1x16xf32> to vector<1x8xf32>
    %167 = vector.extract_strided_slice %165 {offsets = [0, 8], sizes = [1, 8], strides = [1, 1]} : vector<1x16xf32> to vector<1x8xf32>
    %c0_147 = arith.constant 0 : index
    %c0_148 = arith.constant 0 : index
    %c15 = arith.constant 15 : index
    %c0_149 = arith.constant 0 : index
    %168 = vector.load %arg2[%c0_147, %c0_148, %c15, %c0_149] : memref<1x4x16x16xf32, #tpu.memory_space<vmem>>, vector<1x1x1x16xf32>
    %169 = vector.shape_cast %168 : vector<1x1x1x16xf32> to vector<1x16xf32>
    %170 = vector.extract_strided_slice %169 {offsets = [0, 0], sizes = [1, 8], strides = [1, 1]} : vector<1x16xf32> to vector<1x8xf32>
    %171 = vector.extract_strided_slice %169 {offsets = [0, 8], sizes = [1, 8], strides = [1, 1]} : vector<1x16xf32> to vector<1x8xf32>
    %c0_150 = arith.constant 0 : index
    %c1_151 = arith.constant 1 : index
    %c8_152 = arith.constant 8 : index
    %c0_153 = arith.constant 0 : index
    %172 = vector.load %arg2[%c0_150, %c1_151, %c8_152, %c0_153] : memref<1x4x16x16xf32, #tpu.memory_space<vmem>>, vector<1x1x1x16xf32>
    %173 = vector.shape_cast %172 : vector<1x1x1x16xf32> to vector<1x16xf32>
    %174 = vector.extract_strided_slice %173 {offsets = [0, 0], sizes = [1, 8], strides = [1, 1]} : vector<1x16xf32> to vector<1x8xf32>
    %175 = vector.extract_strided_slice %173 {offsets = [0, 8], sizes = [1, 8], strides = [1, 1]} : vector<1x16xf32> to vector<1x8xf32>
    %c0_154 = arith.constant 0 : index
    %c1_155 = arith.constant 1 : index
    %c9_156 = arith.constant 9 : index
    %c0_157 = arith.constant 0 : index
    %176 = vector.load %arg2[%c0_154, %c1_155, %c9_156, %c0_157] : memref<1x4x16x16xf32, #tpu.memory_space<vmem>>, vector<1x1x1x16xf32>
    %177 = vector.shape_cast %176 : vector<1x1x1x16xf32> to vector<1x16xf32>
    %178 = vector.extract_strided_slice %177 {offsets = [0, 0], sizes = [1, 8], strides = [1, 1]} : vector<1x16xf32> to vector<1x8xf32>
    %179 = vector.extract_strided_slice %177 {offsets = [0, 8], sizes = [1, 8], strides = [1, 1]} : vector<1x16xf32> to vector<1x8xf32>
    %c0_158 = arith.constant 0 : index
    %c1_159 = arith.constant 1 : index
    %c10_160 = arith.constant 10 : index
    %c0_161 = arith.constant 0 : index
    %180 = vector.load %arg2[%c0_158, %c1_159, %c10_160, %c0_161] : memref<1x4x16x16xf32, #tpu.memory_space<vmem>>, vector<1x1x1x16xf32>
    %181 = vector.shape_cast %180 : vector<1x1x1x16xf32> to vector<1x16xf32>
    %182 = vector.extract_strided_slice %181 {offsets = [0, 0], sizes = [1, 8], strides = [1, 1]} : vector<1x16xf32> to vector<1x8xf32>
    %183 = vector.extract_strided_slice %181 {offsets = [0, 8], sizes = [1, 8], strides = [1, 1]} : vector<1x16xf32> to vector<1x8xf32>
    %c0_162 = arith.constant 0 : index
    %c1_163 = arith.constant 1 : index
    %c11_164 = arith.constant 11 : index
    %c0_165 = arith.constant 0 : index
    %184 = vector.load %arg2[%c0_162, %c1_163, %c11_164, %c0_165] : memref<1x4x16x16xf32, #tpu.memory_space<vmem>>, vector<1x1x1x16xf32>
    %185 = vector.shape_cast %184 : vector<1x1x1x16xf32> to vector<1x16xf32>
    %186 = vector.extract_strided_slice %185 {offsets = [0, 0], sizes = [1, 8], strides = [1, 1]} : vector<1x16xf32> to vector<1x8xf32>
    %187 = vector.extract_strided_slice %185 {offsets = [0, 8], sizes = [1, 8], strides = [1, 1]} : vector<1x16xf32> to vector<1x8xf32>
    %c0_166 = arith.constant 0 : index
    %c1_167 = arith.constant 1 : index
    %c12_168 = arith.constant 12 : index
    %c0_169 = arith.constant 0 : index
    %188 = vector.load %arg2[%c0_166, %c1_167, %c12_168, %c0_169] : memref<1x4x16x16xf32, #tpu.memory_space<vmem>>, vector<1x1x1x16xf32>
    %189 = vector.shape_cast %188 : vector<1x1x1x16xf32> to vector<1x16xf32>
    %190 = vector.extract_strided_slice %189 {offsets = [0, 0], sizes = [1, 8], strides = [1, 1]} : vector<1x16xf32> to vector<1x8xf32>
    %191 = vector.extract_strided_slice %189 {offsets = [0, 8], sizes = [1, 8], strides = [1, 1]} : vector<1x16xf32> to vector<1x8xf32>
    %c0_170 = arith.constant 0 : index
    %c1_171 = arith.constant 1 : index
    %c13_172 = arith.constant 13 : index
    %c0_173 = arith.constant 0 : index
    %192 = vector.load %arg2[%c0_170, %c1_171, %c13_172, %c0_173] : memref<1x4x16x16xf32, #tpu.memory_space<vmem>>, vector<1x1x1x16xf32>
    %193 = vector.shape_cast %192 : vector<1x1x1x16xf32> to vector<1x16xf32>
    %194 = vector.extract_strided_slice %193 {offsets = [0, 0], sizes = [1, 8], strides = [1, 1]} : vector<1x16xf32> to vector<1x8xf32>
    %195 = vector.extract_strided_slice %193 {offsets = [0, 8], sizes = [1, 8], strides = [1, 1]} : vector<1x16xf32> to vector<1x8xf32>
    %c0_174 = arith.constant 0 : index
    %c1_175 = arith.constant 1 : index
    %c14_176 = arith.constant 14 : index
    %c0_177 = arith.constant 0 : index
    %196 = vector.load %arg2[%c0_174, %c1_175, %c14_176, %c0_177] : memref<1x4x16x16xf32, #tpu.memory_space<vmem>>, vector<1x1x1x16xf32>
    %197 = vector.shape_cast %196 : vector<1x1x1x16xf32> to vector<1x16xf32>
    %198 = vector.extract_strided_slice %197 {offsets = [0, 0], sizes = [1, 8], strides = [1, 1]} : vector<1x16xf32> to vector<1x8xf32>
    %199 = vector.extract_strided_slice %197 {offsets = [0, 8], sizes = [1, 8], strides = [1, 1]} : vector<1x16xf32> to vector<1x8xf32>
    %c0_178 = arith.constant 0 : index
    %c1_179 = arith.constant 1 : index
    %c15_180 = arith.constant 15 : index
    %c0_181 = arith.constant 0 : index
    %200 = vector.load %arg2[%c0_178, %c1_179, %c15_180, %c0_181] : memref<1x4x16x16xf32, #tpu.memory_space<vmem>>, vector<1x1x1x16xf32>
    %201 = vector.shape_cast %200 : vector<1x1x1x16xf32> to vector<1x16xf32>
    %202 = vector.extract_strided_slice %201 {offsets = [0, 0], sizes = [1, 8], strides = [1, 1]} : vector<1x16xf32> to vector<1x8xf32>
    %203 = vector.extract_strided_slice %201 {offsets = [0, 8], sizes = [1, 8], strides = [1, 1]} : vector<1x16xf32> to vector<1x8xf32>
    %c0_182 = arith.constant 0 : index
    %c2_183 = arith.constant 2 : index
    %c8_184 = arith.constant 8 : index
    %c0_185 = arith.constant 0 : index
    %204 = vector.load %arg2[%c0_182, %c2_183, %c8_184, %c0_185] : memref<1x4x16x16xf32, #tpu.memory_space<vmem>>, vector<1x1x1x16xf32>
    %205 = vector.shape_cast %204 : vector<1x1x1x16xf32> to vector<1x16xf32>
    %206 = vector.extract_strided_slice %205 {offsets = [0, 0], sizes = [1, 8], strides = [1, 1]} : vector<1x16xf32> to vector<1x8xf32>
    %207 = vector.extract_strided_slice %205 {offsets = [0, 8], sizes = [1, 8], strides = [1, 1]} : vector<1x16xf32> to vector<1x8xf32>
    %c0_186 = arith.constant 0 : index
    %c2_187 = arith.constant 2 : index
    %c9_188 = arith.constant 9 : index
    %c0_189 = arith.constant 0 : index
    %208 = vector.load %arg2[%c0_186, %c2_187, %c9_188, %c0_189] : memref<1x4x16x16xf32, #tpu.memory_space<vmem>>, vector<1x1x1x16xf32>
    %209 = vector.shape_cast %208 : vector<1x1x1x16xf32> to vector<1x16xf32>
    %210 = vector.extract_strided_slice %209 {offsets = [0, 0], sizes = [1, 8], strides = [1, 1]} : vector<1x16xf32> to vector<1x8xf32>
    %211 = vector.extract_strided_slice %209 {offsets = [0, 8], sizes = [1, 8], strides = [1, 1]} : vector<1x16xf32> to vector<1x8xf32>
    %c0_190 = arith.constant 0 : index
    %c2_191 = arith.constant 2 : index
    %c10_192 = arith.constant 10 : index
    %c0_193 = arith.constant 0 : index
    %212 = vector.load %arg2[%c0_190, %c2_191, %c10_192, %c0_193] : memref<1x4x16x16xf32, #tpu.memory_space<vmem>>, vector<1x1x1x16xf32>
    %213 = vector.shape_cast %212 : vector<1x1x1x16xf32> to vector<1x16xf32>
    %214 = vector.extract_strided_slice %213 {offsets = [0, 0], sizes = [1, 8], strides = [1, 1]} : vector<1x16xf32> to vector<1x8xf32>
    %215 = vector.extract_strided_slice %213 {offsets = [0, 8], sizes = [1, 8], strides = [1, 1]} : vector<1x16xf32> to vector<1x8xf32>
    %c0_194 = arith.constant 0 : index
    %c2_195 = arith.constant 2 : index
    %c11_196 = arith.constant 11 : index
    %c0_197 = arith.constant 0 : index
    %216 = vector.load %arg2[%c0_194, %c2_195, %c11_196, %c0_197] : memref<1x4x16x16xf32, #tpu.memory_space<vmem>>, vector<1x1x1x16xf32>
    %217 = vector.shape_cast %216 : vector<1x1x1x16xf32> to vector<1x16xf32>
    %218 = vector.extract_strided_slice %217 {offsets = [0, 0], sizes = [1, 8], strides = [1, 1]} : vector<1x16xf32> to vector<1x8xf32>
    %219 = vector.extract_strided_slice %217 {offsets = [0, 8], sizes = [1, 8], strides = [1, 1]} : vector<1x16xf32> to vector<1x8xf32>
    %c0_198 = arith.constant 0 : index
    %c2_199 = arith.constant 2 : index
    %c12_200 = arith.constant 12 : index
    %c0_201 = arith.constant 0 : index
    %220 = vector.load %arg2[%c0_198, %c2_199, %c12_200, %c0_201] : memref<1x4x16x16xf32, #tpu.memory_space<vmem>>, vector<1x1x1x16xf32>
    %221 = vector.shape_cast %220 : vector<1x1x1x16xf32> to vector<1x16xf32>
    %222 = vector.extract_strided_slice %221 {offsets = [0, 0], sizes = [1, 8], strides = [1, 1]} : vector<1x16xf32> to vector<1x8xf32>
    %223 = vector.extract_strided_slice %221 {offsets = [0, 8], sizes = [1, 8], strides = [1, 1]} : vector<1x16xf32> to vector<1x8xf32>
    %c0_202 = arith.constant 0 : index
    %c2_203 = arith.constant 2 : index
    %c13_204 = arith.constant 13 : index
    %c0_205 = arith.constant 0 : index
    %224 = vector.load %arg2[%c0_202, %c2_203, %c13_204, %c0_205] : memref<1x4x16x16xf32, #tpu.memory_space<vmem>>, vector<1x1x1x16xf32>
    %225 = vector.shape_cast %224 : vector<1x1x1x16xf32> to vector<1x16xf32>
    %226 = vector.extract_strided_slice %225 {offsets = [0, 0], sizes = [1, 8], strides = [1, 1]} : vector<1x16xf32> to vector<1x8xf32>
    %227 = vector.extract_strided_slice %225 {offsets = [0, 8], sizes = [1, 8], strides = [1, 1]} : vector<1x16xf32> to vector<1x8xf32>
    %c0_206 = arith.constant 0 : index
    %c2_207 = arith.constant 2 : index
    %c14_208 = arith.constant 14 : index
    %c0_209 = arith.constant 0 : index
    %228 = vector.load %arg2[%c0_206, %c2_207, %c14_208, %c0_209] : memref<1x4x16x16xf32, #tpu.memory_space<vmem>>, vector<1x1x1x16xf32>
    %229 = vector.shape_cast %228 : vector<1x1x1x16xf32> to vector<1x16xf32>
    %230 = vector.extract_strided_slice %229 {offsets = [0, 0], sizes = [1, 8], strides = [1, 1]} : vector<1x16xf32> to vector<1x8xf32>
    %231 = vector.extract_strided_slice %229 {offsets = [0, 8], sizes = [1, 8], strides = [1, 1]} : vector<1x16xf32> to vector<1x8xf32>
    %c0_210 = arith.constant 0 : index
    %c2_211 = arith.constant 2 : index
    %c15_212 = arith.constant 15 : index
    %c0_213 = arith.constant 0 : index
    %232 = vector.load %arg2[%c0_210, %c2_211, %c15_212, %c0_213] : memref<1x4x16x16xf32, #tpu.memory_space<vmem>>, vector<1x1x1x16xf32>
    %233 = vector.shape_cast %232 : vector<1x1x1x16xf32> to vector<1x16xf32>
    %234 = vector.extract_strided_slice %233 {offsets = [0, 0], sizes = [1, 8], strides = [1, 1]} : vector<1x16xf32> to vector<1x8xf32>
    %235 = vector.extract_strided_slice %233 {offsets = [0, 8], sizes = [1, 8], strides = [1, 1]} : vector<1x16xf32> to vector<1x8xf32>
    %c0_214 = arith.constant 0 : index
    %c3_215 = arith.constant 3 : index
    %c8_216 = arith.constant 8 : index
    %c0_217 = arith.constant 0 : index
    %236 = vector.load %arg2[%c0_214, %c3_215, %c8_216, %c0_217] : memref<1x4x16x16xf32, #tpu.memory_space<vmem>>, vector<1x1x1x16xf32>
    %237 = vector.shape_cast %236 : vector<1x1x1x16xf32> to vector<1x16xf32>
    %238 = vector.extract_strided_slice %237 {offsets = [0, 0], sizes = [1, 8], strides = [1, 1]} : vector<1x16xf32> to vector<1x8xf32>
    %239 = vector.extract_strided_slice %237 {offsets = [0, 8], sizes = [1, 8], strides = [1, 1]} : vector<1x16xf32> to vector<1x8xf32>
    %c0_218 = arith.constant 0 : index
    %c3_219 = arith.constant 3 : index
    %c9_220 = arith.constant 9 : index
    %c0_221 = arith.constant 0 : index
    %240 = vector.load %arg2[%c0_218, %c3_219, %c9_220, %c0_221] : memref<1x4x16x16xf32, #tpu.memory_space<vmem>>, vector<1x1x1x16xf32>
    %241 = vector.shape_cast %240 : vector<1x1x1x16xf32> to vector<1x16xf32>
    %242 = vector.extract_strided_slice %241 {offsets = [0, 0], sizes = [1, 8], strides = [1, 1]} : vector<1x16xf32> to vector<1x8xf32>
    %243 = vector.extract_strided_slice %241 {offsets = [0, 8], sizes = [1, 8], strides = [1, 1]} : vector<1x16xf32> to vector<1x8xf32>
    %c0_222 = arith.constant 0 : index
    %c3_223 = arith.constant 3 : index
    %c10_224 = arith.constant 10 : index
    %c0_225 = arith.constant 0 : index
    %244 = vector.load %arg2[%c0_222, %c3_223, %c10_224, %c0_225] : memref<1x4x16x16xf32, #tpu.memory_space<vmem>>, vector<1x1x1x16xf32>
    %245 = vector.shape_cast %244 : vector<1x1x1x16xf32> to vector<1x16xf32>
    %246 = vector.extract_strided_slice %245 {offsets = [0, 0], sizes = [1, 8], strides = [1, 1]} : vector<1x16xf32> to vector<1x8xf32>
    %247 = vector.extract_strided_slice %245 {offsets = [0, 8], sizes = [1, 8], strides = [1, 1]} : vector<1x16xf32> to vector<1x8xf32>
    %c0_226 = arith.constant 0 : index
    %c3_227 = arith.constant 3 : index
    %c11_228 = arith.constant 11 : index
    %c0_229 = arith.constant 0 : index
    %248 = vector.load %arg2[%c0_226, %c3_227, %c11_228, %c0_229] : memref<1x4x16x16xf32, #tpu.memory_space<vmem>>, vector<1x1x1x16xf32>
    %249 = vector.shape_cast %248 : vector<1x1x1x16xf32> to vector<1x16xf32>
    %250 = vector.extract_strided_slice %249 {offsets = [0, 0], sizes = [1, 8], strides = [1, 1]} : vector<1x16xf32> to vector<1x8xf32>
    %251 = vector.extract_strided_slice %249 {offsets = [0, 8], sizes = [1, 8], strides = [1, 1]} : vector<1x16xf32> to vector<1x8xf32>
    %c0_230 = arith.constant 0 : index
    %c3_231 = arith.constant 3 : index
    %c12_232 = arith.constant 12 : index
    %c0_233 = arith.constant 0 : index
    %252 = vector.load %arg2[%c0_230, %c3_231, %c12_232, %c0_233] : memref<1x4x16x16xf32, #tpu.memory_space<vmem>>, vector<1x1x1x16xf32>
    %253 = vector.shape_cast %252 : vector<1x1x1x16xf32> to vector<1x16xf32>
    %254 = vector.extract_strided_slice %253 {offsets = [0, 0], sizes = [1, 8], strides = [1, 1]} : vector<1x16xf32> to vector<1x8xf32>
    %255 = vector.extract_strided_slice %253 {offsets = [0, 8], sizes = [1, 8], strides = [1, 1]} : vector<1x16xf32> to vector<1x8xf32>
    %c0_234 = arith.constant 0 : index
    %c3_235 = arith.constant 3 : index
    %c13_236 = arith.constant 13 : index
    %c0_237 = arith.constant 0 : index
    %256 = vector.load %arg2[%c0_234, %c3_235, %c13_236, %c0_237] : memref<1x4x16x16xf32, #tpu.memory_space<vmem>>, vector<1x1x1x16xf32>
    %257 = vector.shape_cast %256 : vector<1x1x1x16xf32> to vector<1x16xf32>
    %258 = vector.extract_strided_slice %257 {offsets = [0, 0], sizes = [1, 8], strides = [1, 1]} : vector<1x16xf32> to vector<1x8xf32>
    %259 = vector.extract_strided_slice %257 {offsets = [0, 8], sizes = [1, 8], strides = [1, 1]} : vector<1x16xf32> to vector<1x8xf32>
    %c0_238 = arith.constant 0 : index
    %c3_239 = arith.constant 3 : index
    %c14_240 = arith.constant 14 : index
    %c0_241 = arith.constant 0 : index
    %260 = vector.load %arg2[%c0_238, %c3_239, %c14_240, %c0_241] : memref<1x4x16x16xf32, #tpu.memory_space<vmem>>, vector<1x1x1x16xf32>
    %261 = vector.shape_cast %260 : vector<1x1x1x16xf32> to vector<1x16xf32>
    %262 = vector.extract_strided_slice %261 {offsets = [0, 0], sizes = [1, 8], strides = [1, 1]} : vector<1x16xf32> to vector<1x8xf32>
    %263 = vector.extract_strided_slice %261 {offsets = [0, 8], sizes = [1, 8], strides = [1, 1]} : vector<1x16xf32> to vector<1x8xf32>
    %c0_242 = arith.constant 0 : index
    %c3_243 = arith.constant 3 : index
    %c15_244 = arith.constant 15 : index
    %c0_245 = arith.constant 0 : index
    %264 = vector.load %arg2[%c0_242, %c3_243, %c15_244, %c0_245] : memref<1x4x16x16xf32, #tpu.memory_space<vmem>>, vector<1x1x1x16xf32>
    %265 = vector.shape_cast %264 : vector<1x1x1x16xf32> to vector<1x16xf32>
    %266 = vector.extract_strided_slice %265 {offsets = [0, 0], sizes = [1, 8], strides = [1, 1]} : vector<1x16xf32> to vector<1x8xf32>
    %267 = vector.extract_strided_slice %265 {offsets = [0, 8], sizes = [1, 8], strides = [1, 1]} : vector<1x16xf32> to vector<1x8xf32>
    %268 = tpu.concatenate %142, %146, %150, %154, %158, %162, %166, %170, %174, %178, %182, %186, %190, %194, %198, %202 in 1 : vector<1x8xf32>, vector<1x8xf32>, vector<1x8xf32>, vector<1x8xf32>, vector<1x8xf32>, vector<1x8xf32>, vector<1x8xf32>, vector<1x8xf32>, vector<1x8xf32>, vector<1x8xf32>, vector<1x8xf32>, vector<1x8xf32>, vector<1x8xf32>, vector<1x8xf32>, vector<1x8xf32>, vector<1x8xf32> -> vector<1x128xf32>
    %269 = tpu.concatenate %206, %210, %214, %218, %222, %226, %230, %234, %238, %242, %246, %250, %254, %258, %262, %266 in 1 : vector<1x8xf32>, vector<1x8xf32>, vector<1x8xf32>, vector<1x8xf32>, vector<1x8xf32>, vector<1x8xf32>, vector<1x8xf32>, vector<1x8xf32>, vector<1x8xf32>, vector<1x8xf32>, vector<1x8xf32>, vector<1x8xf32>, vector<1x8xf32>, vector<1x8xf32>, vector<1x8xf32>, vector<1x8xf32> -> vector<1x128xf32>
    %270 = tpu.concatenate %268, %269 in 1 : vector<1x128xf32>, vector<1x128xf32> -> vector<1x256xf32>
    %c0_246 = arith.constant 0 : index
    %c2_247 = arith.constant 2 : index
    %c0_248 = arith.constant 0 : index
    %271 = vector.load %arg3[%c0_246, %c2_247, %c0_248] : memref<1x4x256xf32, #tpu.memory_space<vmem>>, vector<1x1x256xf32>
    %272 = vector.shape_cast %271 : vector<1x1x256xf32> to vector<1x256xf32>
    %273 = vector.shape_cast %270 : vector<1x256xf32> to vector<1x1x256xf32>
    tpu.vector_store %arg3[%c0_246, %c2_247, %c0_248], %273 {strides = array<i32>} : memref<1x4x256xf32, #tpu.memory_space<vmem>>, vector<1x1x256xf32>,
    %274 = tpu.concatenate %143, %147, %151, %155, %159, %163, %167, %171, %175, %179, %183, %187, %191, %195, %199, %203 in 1 : vector<1x8xf32>, vector<1x8xf32>, vector<1x8xf32>, vector<1x8xf32>, vector<1x8xf32>, vector<1x8xf32>, vector<1x8xf32>, vector<1x8xf32>, vector<1x8xf32>, vector<1x8xf32>, vector<1x8xf32>, vector<1x8xf32>, vector<1x8xf32>, vector<1x8xf32>, vector<1x8xf32>, vector<1x8xf32> -> vector<1x128xf32>
    %275 = tpu.concatenate %207, %211, %215, %219, %223, %227, %231, %235, %239, %243, %247, %251, %255, %259, %263, %267 in 1 : vector<1x8xf32>, vector<1x8xf32>, vector<1x8xf32>, vector<1x8xf32>, vector<1x8xf32>, vector<1x8xf32>, vector<1x8xf32>, vector<1x8xf32>, vector<1x8xf32>, vector<1x8xf32>, vector<1x8xf32>, vector<1x8xf32>, vector<1x8xf32>, vector<1x8xf32>, vector<1x8xf32>, vector<1x8xf32> -> vector<1x128xf32>
    %276 = tpu.concatenate %274, %275 in 1 : vector<1x128xf32>, vector<1x128xf32> -> vector<1x256xf32>
    %c0_249 = arith.constant 0 : index
    %c3_250 = arith.constant 3 : index
    %c0_251 = arith.constant 0 : index
    %277 = vector.load %arg3[%c0_249, %c3_250, %c0_251] : memref<1x4x256xf32, #tpu.memory_space<vmem>>, vector<1x1x256xf32>
    %278 = vector.shape_cast %277 : vector<1x1x256xf32> to vector<1x256xf32>
    %279 = vector.shape_cast %276 : vector<1x256xf32> to vector<1x1x256xf32>
    tpu.vector_store %arg3[%c0_249, %c3_250, %c0_251], %279 {strides = array<i32>} : memref<1x4x256xf32, #tpu.memory_space<vmem>>, vector<1x1x256xf32>,
    return
  }
  func.func @transform_0(%arg0: i32, %arg1: i32) -> (i32, i32, i32, i32) {
    %c0_i32 = arith.constant 0 : i32
    %c0_i32_0 = arith.constant 0 : i32
    %c0_i32_1 = arith.constant 0 : i32
    return %arg0, %c0_i32, %arg1, %c0_i32_0 : i32, i32, i32, i32
  }
  func.func @transform_1(%arg0: i32, %arg1: i32) -> (i32, i32, i32) {
    %c0_i32 = arith.constant 0 : i32
    %c0_i32_0 = arith.constant 0 : i32
    return %arg0, %arg1, %c0_i32 : i32, i32, i32
  }
}

module attributes {stable_mosaic.version = 11 : i64} {
  func.func @_patchify_kernel_blocked(%arg0: i32, %arg1: i32, %arg2: memref<1x4x16x16xf32, #tpu.memory_space<vmem>>, %arg3: memref<1x4x4x8x8xf32, #tpu.memory_space<vmem>>) attributes {dimension_semantics = [#tpu.dimension_semantics<parallel>, #tpu.dimension_semantics<parallel>], iteration_bounds = array<i64: 2, 1>, scalar_prefetch = 0 : i64, scratch_operands = 0 : i64, tpu.core_type = #tpu.core_type<tc>, window_params = [{transform_indices = @transform_0, window_bounds = array<i64: 1, 4, 16, 16>}, {transform_indices = @transform_1, window_bounds = array<i64: 1, 4, 4, 8, 8>}]} {
    %c0 = arith.constant 0 : index
    %c0_0 = arith.constant 0 : index
    %c0_1 = arith.constant 0 : index
    %c0_2 = arith.constant 0 : index
    %0 = vector.load %arg2[%c0, %c0_0, %c0_1, %c0_2] : memref<1x4x16x16xf32, #tpu.memory_space<vmem>>, vector<1x4x8x8xf32>
    %1 = vector.shape_cast %0 : vector<1x4x8x8xf32> to vector<4x8x8xf32>
    %c0_3 = arith.constant 0 : index
    %c0_4 = arith.constant 0 : index
    %c0_5 = arith.constant 0 : index
    %c0_6 = arith.constant 0 : index
    %c0_7 = arith.constant 0 : index
    %2 = vector.load %arg3[%c0_3, %c0_4, %c0_5, %c0_6, %c0_7] : memref<1x4x4x8x8xf32, #tpu.memory_space<vmem>>, vector<1x1x4x8x8xf32>
    %3 = vector.shape_cast %2 : vector<1x1x4x8x8xf32> to vector<4x8x8xf32>
    %4 = vector.shape_cast %1 : vector<4x8x8xf32> to vector<1x1x4x8x8xf32>
    tpu.vector_store %arg3[%c0_3, %c0_4, %c0_5, %c0_6, %c0_7], %4 {strides = array<i32>} : memref<1x4x4x8x8xf32, #tpu.memory_space<vmem>>, vector<1x1x4x8x8xf32>,
    %c0_8 = arith.constant 0 : index
    %c0_9 = arith.constant 0 : index
    %c0_10 = arith.constant 0 : index
    %c8 = arith.constant 8 : index
    %5 = vector.load %arg2[%c0_8, %c0_9, %c0_10, %c8] : memref<1x4x16x16xf32, #tpu.memory_space<vmem>>, vector<1x4x8x8xf32>
    %6 = vector.shape_cast %5 : vector<1x4x8x8xf32> to vector<4x8x8xf32>
    %c0_11 = arith.constant 0 : index
    %c1 = arith.constant 1 : index
    %c0_12 = arith.constant 0 : index
    %c0_13 = arith.constant 0 : index
    %c0_14 = arith.constant 0 : index
    %7 = vector.load %arg3[%c0_11, %c1, %c0_12, %c0_13, %c0_14] : memref<1x4x4x8x8xf32, #tpu.memory_space<vmem>>, vector<1x1x4x8x8xf32>
    %8 = vector.shape_cast %7 : vector<1x1x4x8x8xf32> to vector<4x8x8xf32>
    %9 = vector.shape_cast %6 : vector<4x8x8xf32> to vector<1x1x4x8x8xf32>
    tpu.vector_store %arg3[%c0_11, %c1, %c0_12, %c0_13, %c0_14], %9 {strides = array<i32>} : memref<1x4x4x8x8xf32, #tpu.memory_space<vmem>>, vector<1x1x4x8x8xf32>,
    %c0_15 = arith.constant 0 : index
    %c0_16 = arith.constant 0 : index
    %c8_17 = arith.constant 8 : index
    %c0_18 = arith.constant 0 : index
    %10 = vector.load %arg2[%c0_15, %c0_16, %c8_17, %c0_18] : memref<1x4x16x16xf32, #tpu.memory_space<vmem>>, vector<1x4x8x8xf32>
    %11 = vector.shape_cast %10 : vector<1x4x8x8xf32> to vector<4x8x8xf32>
    %c0_19 = arith.constant 0 : index
    %c2 = arith.constant 2 : index
    %c0_20 = arith.constant 0 : index
    %c0_21 = arith.constant 0 : index
    %c0_22 = arith.constant 0 : index
    %12 = vector.load %arg3[%c0_19, %c2, %c0_20, %c0_21, %c0_22] : memref<1x4x4x8x8xf32, #tpu.memory_space<vmem>>, vector<1x1x4x8x8xf32>
    %13 = vector.shape_cast %12 : vector<1x1x4x8x8xf32> to vector<4x8x8xf32>
    %14 = vector.shape_cast %11 : vector<4x8x8xf32> to vector<1x1x4x8x8xf32>
    tpu.vector_store %arg3[%c0_19, %c2, %c0_20, %c0_21, %c0_22], %14 {strides = array<i32>} : memref<1x4x4x8x8xf32, #tpu.memory_space<vmem>>, vector<1x1x4x8x8xf32>,
    %c0_23 = arith.constant 0 : index
    %c0_24 = arith.constant 0 : index
    %c8_25 = arith.constant 8 : index
    %c8_26 = arith.constant 8 : index
    %15 = vector.load %arg2[%c0_23, %c0_24, %c8_25, %c8_26] : memref<1x4x16x16xf32, #tpu.memory_space<vmem>>, vector<1x4x8x8xf32>
    %16 = vector.shape_cast %15 : vector<1x4x8x8xf32> to vector<4x8x8xf32>
    %c0_27 = arith.constant 0 : index
    %c3 = arith.constant 3 : index
    %c0_28 = arith.constant 0 : index
    %c0_29 = arith.constant 0 : index
    %c0_30 = arith.constant 0 : index
    %17 = vector.load %arg3[%c0_27, %c3, %c0_28, %c0_29, %c0_30] : memref<1x4x4x8x8xf32, #tpu.memory_space<vmem>>, vector<1x1x4x8x8xf32>
    %18 = vector.shape_cast %17 : vector<1x1x4x8x8xf32> to vector<4x8x8xf32>
    %19 = vector.shape_cast %16 : vector<4x8x8xf32> to vector<1x1x4x8x8xf32>
    tpu.vector_store %arg3[%c0_27, %c3, %c0_28, %c0_29, %c0_30], %19 {strides = array<i32>} : memref<1x4x4x8x8xf32, #tpu.memory_space<vmem>>, vector<1x1x4x8x8xf32>,
    return
  }
  func.func @transform_0(%arg0: i32, %arg1: i32) -> (i32, i32, i32, i32) {
    %c0_i32 = arith.constant 0 : i32
    %c0_i32_0 = arith.constant 0 : i32
    %c0_i32_1 = arith.constant 0 : i32
    return %arg0, %c0_i32, %arg1, %c0_i32_0 : i32, i32, i32, i32
  }
  func.func @transform_1(%arg0: i32, %arg1: i32) -> (i32, i32, i32, i32, i32) {
    %c0_i32 = arith.constant 0 : i32
    %c0_i32_0 = arith.constant 0 : i32
    %c0_i32_1 = arith.constant 0 : i32
    %c0_i32_2 = arith.constant 0 : i32
    return %arg0, %arg1, %c0_i32, %c0_i32_0, %c0_i32_1 : i32, i32, i32, i32, i32
  }
}

</mosaic_0001>

<bundles_post_ra>
// kernel: tpu_custom_call.1
= control target key start
LH: loop header
LB: loop body
LE: loop exit
PB: predicated region body
PF: predicated region fallthrough
CT: control target
= control target key end

     0   :  { %6 = vsyncpa [#allocation3], 0  ;;  %s1874_s0 = inlined_call_operand.hbm [shape: f32[2,4,16,16], index: 0, kind: input, shape index: {}]   ;;  %s1875_s1 = inlined_call_operand.hbm [shape: f32[2,4,256], index: 1, kind: output, shape index: {}]  }
   0x1   :  { %8 = vsyncpa [#allocation3 + $0x1], 0 }
   0x2   :  { %9 = vsyncpa [#allocation4], 0 }
   0x3   :  { %11 = vsyncpa [#allocation4 + $0x1], 0  ;;  %s1205_s6 = smov 0   ;;  %s1207_s7 = smov 0  }
   0x4   :  { %s1209_s8 = smov 0   ;;  %s1211_s9 = smov 0  }
   0x5   :  { %s1213_s10 = smov 0   ;;  %s1215_s11 = smov 0  }
   0x6 LB: > { %s917_s12 = sadd.s32 4294967295, %s1176_s11   ;;  %s918_s13 = sadd.s32 4294967294, %s1176_s11   ;;  %s1176_s11 = sphi %s1215_s11, %s17_s11   ;;  %s1172_s10 = sphi %s1213_s10, %s1912_s10   ;;  %s1168_s9 = sphi %s1211_s9, %s1911_s9   ;;  %s1164_s8 = sphi %s1209_s8, %s1910_s8   ;;  %s1160_s7 = sphi %s1207_s7, %s1909_s7   ;;  %s1156_s6 = sphi %s1205_s6, %s1908_s6  }
   0x7   : > { %s29_s14 = sadd.s32 1, %s1172_s10  ;;  %s38_s15 = sadd.s32 1, %s1164_s8 }
   0x8   : > { %p31_p0 = scmp.ge.s32.totalorder %s29_s14, 2  ;;  %p45_p1 = scmp.ne.s32.totalorder %s1164_s8, %s1160_s7 }
   0x9   : > { %p46_p2 = scmp.eq.s32.totalorder %s1176_s11, 0  ;;  %p51_p3 = scmp.ne.s32.totalorder %s1160_s7, %s1156_s6 }
   0xa   : > { %s1914_s14 = smov (%p31_p0, %s29_s14), 0  ;;  %p52_p5 = scmp.eq.s32.totalorder %s917_s12, 0 }
   0xb   : > { %p1246_p4 = por %p46_p2, %p45_p1  ;;  %s33_s17 = ssub.s32 %s1172_s10, %s1914_s14 }
   0xc   : > { %p77_p6 = scmp.eq.s32.totalorder %s917_s12, 1  ;;  %p36_p7 = scmp.eq.s32.totalorder %s33_s17, 0 }
   0xd   : > { %p1252_p8 = por %p52_p5, %p51_p3  ;;  %p83_p10 = scmp.eq.s32.totalorder %s918_s13, 1 }
   0xe   : > { %p1256_p9 = por %p77_p6, %p45_p1  ;;  %p920_p12 = scmp.ge.s32.totalorder %s1176_s11, 2 }
   0xf   : > { %s1261_s20 = scalar_select %p36_p7, %s1164_s8, %s38_s15  }
  0x10   : > { %p1263_p11 = por %p83_p10, %p51_p3  ;;  %p997_p13 = scmp.lt.s32.totalorder %s1176_s11, 2 }
  0x11   : > { %s103_s22 = sand.u32 1, %s1164_s8   ;;  %s983_s24 = sshll.u32 %s1172_s10, 6 }
  0x12   : > { %s921_s23 = sshll.u32 %s103_s22, 6  ;;  %s114_s27 = scalar_lea.hbm %s1874_s0, %s983_s24 }
  0x13   : > { %s107_s28 = scalar_lea.vmem [#allocation2], %s921_s23  ;;  %s115_s30 = sshll.u32 %s114_s27, 4  ;;  %s116_s30 = int_to_ptr.hbm [resolvable:$true] %s115_s30 }
  0x14   : > { %s117_s29 = sshll.u32 %s107_s28, 4  ;;  %p990_p0 = pnand %p997_p13, %p1246_p4  ;;  %s118_s29 = int_to_ptr.vmem [resolvable:$true] %s117_s29 }
  0x15   : > { %p924_p1 = scmp.ge.s32.totalorder %s1176_s11, 1  ;;  %s104_s2 = scalar_lea.sflag [#allocation3], %s103_s22 }
  0x16   : > { %s1178_s3 = smov 128   ;;  %s1179_s4 = smov 8  }
  0x17   : > { %992 = dma.hbm_to_vmem [thread:$0]  (!%p990_p0), %s116_s30, 1024, %s118_s29, %s104_s2, %s1178_s3, %s1178_s3, %s1179_s4  }
  0x18   : > { %p125_p2 = scmp.lt.s32.totalorder %s1176_s11, 3 }
  0x1a   : > { %p126_p3 = pnand %p924_p1, %p125_p2 }
  0x1b   : > { %s1279_s5 = sand.u32 (!%p126_p3), 1, %s1160_s7  }
  0x1c   : > { %129 = sbr.rel (%p126_p3) target bundleno = 470 (0x1d6), region = 24  ;;  %s925_s12 = sshll.u32 (!%p126_p3), %s1279_s5, 6 }
  0x1d   : > { %s132_s13 = scalar_lea.sflag (!%p126_p3), [#allocation3], %s1279_s5  ;;  %s1283_s15 = scalar_lea.vmem (!%p126_p3), [#allocation2], %s925_s12 }
  0x21   : > { %1147 = dma.done.wait (%p1252_p8), %s132_s13, 1024  }
  0x22   : > { %1149 = vsyncadd (%p1252_p8), %s132_s13, 4294966272  ;;  %v1290_v0 = vld [vmem:[%s1283_s15 + $0x3] sm:$0x1]  ;;  %v1293_v1 = vld [vmem:[%s1283_s15 + $0x1] sm:$0x1]  ;;  %s1180_s16 = smov 24  }
  0x23   : > { %200 = vrot.lane.b32.xlu1 %v1290_v0, %s1180_s16  ;;  %s1181_s17 = smov 8   ;;  %v1300_v2 = vld [vmem:[%s1283_s15 + $0x5] sm:$0x1]  ;;  %s1182_s18 = smov 40   ;;  %v1305_v3 = vld [vmem:[%s1283_s15 + $0x4] sm:$0x1] }
  0x24   : > { %192 = vrot.lane.b32.xlu0 %v1293_v1, %s1181_s17  ;;  %208 = vrot.lane.b32.xlu2 %v1300_v2, %s1182_s18  ;;  %v1308_v4 = vld [vmem:[%s1283_s15 + $0x2] sm:$0x1]  ;;  %s1183_s22 = smov 32   ;;  %s1184_s23 = smov 16   ;;  %v1315_v5 = vld [vmem:[%s1283_s15 + $0x6] sm:$0x1] }
  0x25   : > { %s1185_s24 = smov 48   ;;  %v1320_v6 = vld [vmem:[%s1283_s15 + $0x10] sm:$0x1]  ;;  %v1323_v7 = vld [vmem:[%s1283_s15 + $0x7] sm:$0x1]  ;;  %s1186_s25 = smov 64  }
  0x26   : > { %s1187_s26 = smov 56   ;;  %v928_v8 = vld [vmem:[%s1283_s15 + $0x11] sm:$0x1]  ;;  %s1188_s27 = smov 72   ;;  %v930_v9 = vld [vmem:[%s1283_s15 + $0x13] sm:$0x1] }
  0x27   : > { %v929_v10 = vld [vmem:[%s1283_s15 + $0x12] sm:$0x1]  ;;  %s1189_s28 = smov 88   ;;  %s1190_s29 = smov 80   ;;  %v931_v11 = vld [vmem:[%s1283_s15 + $0x14] sm:$0x1] }
  0x28   : > { %s1191_s30 = smov 96   ;;  %v933_v12 = vld [vmem:[%s1283_s15 + $0x16] sm:$0x1]  ;;  %v932_v13 = vld [vmem:[%s1283_s15 + $0x15] sm:$0x1]  ;;  %s1192_s2 = smov 112  }
  0x29   : > { %s1193_s3 = smov 104   ;;  %v934_v14 = vld [vmem:[%s1283_s15 + $0x17] sm:$0x1]  ;;  %s1194_s4 = smov 120   ;;  %v937_v15 = vld [vmem:[%s1283_s15 + $0x22] sm:$0x1] }
  0x2a   : > { %v1345_v16 = vld [vmem:[%s1283_s15 + $0x21] sm:$0x1]  ;;  %v938_v17 = vld [vmem:[%s1283_s15 + $0x23] sm:$0x1]  ;;  %v1353_v18 = vld [vmem:[%s1283_s15 + $0x25] sm:$0x1] }
  0x2b   : > { %204 = vrot.lane.b32.xlu1 %v1305_v3, %s1183_s22  ;;  %v1356_v19 = vld [vmem:[%s1283_s15 + $0x24] sm:$0x1]  ;;  %v941_v20 = vld [vmem:[%s1283_s15 + $0x26] sm:$0x1]  ;;  %v943_v21 = vld [vmem:[%s1283_s15 + $0x30] sm:$0x1] }
  0x2c   : > { %196 = vrot.lane.b32.xlu0 %v1308_v4, %s1184_s23  ;;  %212 = vrot.lane.b32.xlu2 %v1315_v5, %s1185_s24  ;;  %v942_v22 = vld [vmem:[%s1283_s15 + $0x27] sm:$0x1]  ;;  %v944_v23 = vld [vmem:[%s1283_s15 + $0x31] sm:$0x1]  ;;  %vm251_vm0 = vcmask 64512   ;;  %vm253_vm1 = vcmask 130048  }
  0x2d   : > { %v946_v24 = vld [vmem:[%s1283_s15 + $0x33] sm:$0x1]  ;;  %v945_v25 = vld [vmem:[%s1283_s15 + $0x32] sm:$0x1]  ;;  %v947_v26 = vld [vmem:[%s1283_s15 + $0x34] sm:$0x1] }
  0x2e   : > { %v949_v27 = vld [vmem:[%s1283_s15 + $0x36] sm:$0x1]  ;;  %v948_v28 = vld [vmem:[%s1283_s15 + $0x35] sm:$0x1]  ;;  %v950_v29 = vld [vmem:[%s1283_s15 + $0x37] sm:$0x1] }
  0x2f   : > { %v156_v30 = vld [vmem:[%s1283_s15] sm:$0x1]  ;;  %vm255_vm2 = vcmask 195584   ;;  %vm1880_vm3 = vcmask 261120   ;;  %vm1879_vm4 = vcmask 326656   ;;  %vm261_vm5 = vcmask 392192  }
  0x30   : > { %v935_v36 = vld [vmem:[%s1283_s15 + $0x20] sm:$0x1]  ;;  %v1443_v57 = vld [vmem:[%s1283_s15 + $0xa] sm:$0x1]  ;;  %v1446_v58 = vld [vmem:[%s1283_s15 + $0x9] sm:$0x1] }
  0x31   : > { %v1454_v61 = vld [vmem:[%s1283_s15 + $0xb] sm:$0x1]  ;;  %vm1881_vm6 = vcmask 457728   ;;  %vm265_vm7 = vcmask 523264   ;;  %vm1877_vm8 = vcmask 588800   ;;  %vm1878_vm9 = vcmask 654336  }
  0x32   : > { %vm271_vm10 = vcmask 719872   ;;  %vm273_vm11 = vcmask 785408   ;;  %vm1876_vm12 = vcmask 850944   ;;  %vm277_vm13 = vcmask 916480   ;;  %s926_s12 = sshll.u32 %s1279_s5, 3 }
  0x33   : > { %220 = vrot.lane.b32.xlu1 %v1320_v6, %s1186_s25  ;;  %vm279_vm14 = vcmask 982016   ;;  %vm359_vm15 = vcmask 1040384   ;;  %s1559_s13 = scalar_lea.vmem [#allocation5], %s926_s12 }
  0x34   : > { %216 = vrot.lane.b32.xlu0 %v1323_v7, %s1187_s26  ;;  %224 = vrot.lane.b32.xlu2 %v928_v8, %s1188_s27 }
  0x3b   : > { %232 = vrot.lane.b32.xlu1 %v930_v9, %s1189_s28 }
  0x3c   : > { %228 = vrot.lane.b32.xlu0 %v929_v10, %s1190_s29  ;;  %236 = vrot.lane.b32.xlu2 %v931_v11, %s1191_s30 }
  0x43   : > { %244 = vrot.lane.b32.xlu1 %v933_v12, %s1192_s2 }
  0x44   : > { %240 = vrot.lane.b32.xlu0 %v932_v13, %s1193_s3  ;;  %248 = vrot.lane.b32.xlu2 %v934_v14, %s1194_s4 }
  0x4b   : > { %286 = vrot.lane.b32.xlu1 %v937_v15, %s1184_s23 }
  0x4c   : > { %282 = vrot.lane.b32.xlu0 %v1345_v16, %s1181_s17  ;;  %290 = vrot.lane.b32.xlu2 %v938_v17, %s1180_s16 }
  0x53   : > { %298 = vrot.lane.b32.xlu1 %v1353_v18, %s1182_s18 }
  0x54   : > { %294 = vrot.lane.b32.xlu0 %v1356_v19, %s1183_s22  ;;  %302 = vrot.lane.b32.xlu2 %v941_v20, %s1185_s24 }
  0x5b   : > { %310 = vrot.lane.b32.xlu1 %v943_v21, %s1186_s25 }
  0x5c   : > { %306 = vrot.lane.b32.xlu0 %v942_v22, %s1187_s26  ;;  %314 = vrot.lane.b32.xlu2 %v944_v23, %s1188_s27 }
  0x63   : > { %322 = vrot.lane.b32.xlu1 %v946_v24, %s1189_s28 }
  0x64   : > { %318 = vrot.lane.b32.xlu0 %v945_v25, %s1190_s29  ;;  %326 = vrot.lane.b32.xlu2 %v947_v26, %s1191_s30 }
  0x6b   : > { %334 = vrot.lane.b32.xlu1 %v949_v27, %s1192_s2 }
  0x6c   : > { %330 = vrot.lane.b32.xlu0 %v948_v28, %s1193_s3  ;;  %338 = vrot.lane.b32.xlu2 %v950_v29, %s1194_s4 }
  0x73   : > { %371 = vrot.lane.b32.xlu1 %v1308_v4, %s1181_s17  ;;  %v1464_v4 = vld [vmem:[%s1283_s15 + $0xc] sm:$0x1] }
  0x74   : > { %368 = vrot.lane.b32.xlu0 %v156_v30, %s1194_s4  ;;  %374 = vrot.lane.b32.xlu2 %v1290_v0, %s1184_s23 }
  0x7b   : > { %380 = vrot.lane.b32.xlu1 %v1300_v2, %s1183_s22 }
  0x7c   : > { %377 = vrot.lane.b32.xlu0 %v1305_v3, %s1180_s16  ;;  %383 = vrot.lane.b32.xlu2 %v1315_v5, %s1182_s18  ;;  %v1461_v3 = vld [vmem:[%s1283_s15 + $0xd] sm:$0x1] }
  0x7e   : > { %v209_v31 = vpop.permute.xlu2 %208 }
  0x83   : > { %389 = vrot.lane.b32.xlu1 %v1320_v6, %s1187_s26 }
  0x84   : > { %386 = vrot.lane.b32.xlu0 %v1323_v7, %s1185_s24  ;;  %392 = vrot.lane.b32.xlu2 %v928_v8, %s1186_s25  ;;  %v1472_v7 = vld [vmem:[%s1283_s15 + $0xe] sm:$0x1] }
  0x86   : > { %v1399_v32 = vpop.permute.xlu2 %212 }
  0x8b   : > { %398 = vrot.lane.b32.xlu1 %v930_v9, %s1190_s29 }
  0x8c   : > { %395 = vrot.lane.b32.xlu0 %v929_v10, %s1188_s27  ;;  %401 = vrot.lane.b32.xlu2 %v931_v11, %s1189_s28 }
  0x8e   : > { %v1404_v33 = vpop.permute.xlu2 %224 }
  0x93   : > { %407 = vrot.lane.b32.xlu1 %v933_v12, %s1193_s3 }
  0x94   : > { %404 = vrot.lane.b32.xlu0 %v932_v13, %s1191_s30  ;;  %410 = vrot.lane.b32.xlu2 %v934_v14, %s1192_s2 }
  0x95   : > { %v201_v34 = vpop.permute.xlu1 %200 }
  0x96   : > { %v193_v35 = vpop.permute.xlu0 %192  ;;  %v1410_v37 = vpop.permute.xlu2 %236 }
  0x97   : > { %v252_v38 = vsel %vm251_vm0, %v156_v30, %v193_v35  ;;  %v1512_v30 = vld [vmem:[%s1283_s15 + $0x1a] sm:$0x1] }
  0x9b   : > { %432 = vrot.lane.b32.xlu1 %v937_v15, %s1181_s17  ;;  %v1483_v15 = vld [vmem:[%s1283_s15 + $0x18] sm:$0x1] }
  0x9c   : > { %429 = vrot.lane.b32.xlu0 %v935_v36, %s1194_s4  ;;  %435 = vrot.lane.b32.xlu2 %v938_v17, %s1184_s23  ;;  %v1486_v17 = vld [vmem:[%s1283_s15 + $0xf] sm:$0x1] }
  0x9d   : > { %v205_v39 = vpop.permute.xlu1 %204 }
  0x9e   : > { %v197_v40 = vpop.permute.xlu0 %196  ;;  %v1419_v44 = vpop.permute.xlu2 %248 }
  0x9f   : > { %v254_v41 = vsel %vm253_vm1, %v252_v38, %v197_v40  ;;  %v362_v40 = vlaneseq }
  0xa0   : > { %v256_v42 = vsel %vm255_vm2, %v254_v41, %v201_v34  ;;  %v1524_v34 = vld [vmem:[%s1283_s15 + $0x1c] sm:$0x1] }
  0xa1   : > { %v258_v43 = vsel %vm1880_vm3, %v256_v42, %v205_v39 }
  0xa2   : > { %v260_v45 = vsel %vm1879_vm4, %v258_v43, %v209_v31 }
  0xa3   : > { %441 = vrot.lane.b32.xlu1 %v1353_v18, %s1183_s22  ;;  %v262_v9 = vsel %vm261_vm5, %v260_v45, %v1399_v32  ;;  %v1538_v45 = vld [vmem:[%s1283_s15 + $0x1e] sm:$0x1] }
  0xa4   : > { %438 = vrot.lane.b32.xlu0 %v1356_v19, %s1180_s16  ;;  %444 = vrot.lane.b32.xlu2 %v941_v20, %s1182_s18 }
  0xa5   : > { %v221_v46 = vpop.permute.xlu1 %220 }
  0xa6   : > { %v217_v47 = vpop.permute.xlu0 %216  ;;  %v291_v48 = vpop.permute.xlu2 %290 }
  0xa7   : > { %v264_v12 = vsel %vm1881_vm6, %v262_v9, %v217_v47  ;;  %v1601_v9 = vld [vmem:[%s1283_s15 + $0x38] sm:$0x1] }
  0xa8   : > { %v266_v19 = vsel %vm265_vm7, %v264_v12, %v221_v46  ;;  %v1541_v46 = vld [vmem:[%s1283_s15 + $0x1d] sm:$0x1]  ;;  %v1611_v12 = vld [vmem:[%s1283_s15 + $0x39] sm:$0x1] }
  0xab   : > { %450 = vrot.lane.b32.xlu1 %v943_v21, %s1187_s26  ;;  %v1497_v21 = vld [vmem:[%s1283_s15 + $0x19] sm:$0x1] }
  0xac   : > { %447 = vrot.lane.b32.xlu0 %v942_v22, %s1185_s24  ;;  %453 = vrot.lane.b32.xlu2 %v944_v23, %s1186_s25  ;;  %v268_v22 = vsel %vm1877_vm8, %v266_v19, %v1404_v33  ;;  %v1616_v19 = vld [vmem:[%s1283_s15 + $0x3b] sm:$0x1] }
  0xad   : > { %v1429_v49 = vpop.permute.xlu1 %232 }
  0xae   : > { %v229_v50 = vpop.permute.xlu0 %228  ;;  %v303_v51 = vpop.permute.xlu2 %302 }
  0xaf   : > { %v270_v23 = vsel %vm1878_vm9, %v268_v22, %v229_v50 }
  0xb3   : > { %459 = vrot.lane.b32.xlu1 %v946_v24, %s1190_s29 }
  0xb4   : > { %456 = vrot.lane.b32.xlu0 %v945_v25, %s1188_s27  ;;  %462 = vrot.lane.b32.xlu2 %v947_v26, %s1189_s28 }
  0xb5   : > { %v1434_v52 = vpop.permute.xlu1 %244 }
  0xb6   : > { %v1436_v53 = vpop.permute.xlu0 %240  ;;  %v315_v54 = vpop.permute.xlu2 %314 }
  0xbb   : > { %468 = vrot.lane.b32.xlu1 %v949_v27, %s1193_s3 }
  0xbc   : > { %465 = vrot.lane.b32.xlu0 %v948_v28, %s1191_s30  ;;  %471 = vrot.lane.b32.xlu2 %v950_v29, %s1192_s2  ;;  %v272_v28 = vsel %vm271_vm10, %v270_v23, %v1429_v49  ;;  %v1509_v29 = vld [vmem:[%s1283_s15 + $0x1b] sm:$0x1]  ;;  %v1626_v23 = vld [vmem:[%s1283_s15 + $0x3c] sm:$0x1] }
  0xbd   : > { %v287_v55 = vpop.permute.xlu1 %286  ;;  %v274_v33 = vsel %vm273_vm11, %v272_v28, %v1410_v37 }
  0xbe   : > { %v283_v56 = vpop.permute.xlu0 %282  ;;  %v327_v59 = vpop.permute.xlu2 %326  ;;  %v276_v35 = vsel %vm1876_vm12, %v274_v33, %v1436_v53 }
  0xbf   : > { %v341_v60 = vsel %vm251_vm0, %v935_v36, %v283_v56  ;;  %v278_v41 = vsel %vm277_vm13, %v276_v35, %v1434_v52  ;;  %v1557_v52 = vld [vmem:[%s1283_s15 + $0x1f] sm:$0x1] }
  0xc0   : > { %v342_v62 = vsel %vm253_vm1, %v341_v60, %v287_v55  ;;  %v280_v50 = vsel %vm279_vm14, %v278_v41, %v1419_v44  ;;  %v1570_v55 = vld [vmem:[%s1283_s15 + $0x29] sm:$0x1] }
  0xc1   : > { %v343_v2 = vsel %vm255_vm2, %v342_v62, %v291_v48 }
  0xc3   : > { %533 = vrot.lane.b32.xlu1 %v1443_v57, %s1184_s23 }
  0xc4   : > { %529 = vrot.lane.b32.xlu0 %v1446_v58, %s1181_s17  ;;  %537 = vrot.lane.b32.xlu2 %v1454_v61, %s1180_s16 }
  0xc5   : > { %v299_v63 = vpop.permute.xlu1 %298 }
  0xc6   : > { %v295_v0 = vpop.permute.xlu0 %294  ;;  %v339_v5 = vpop.permute.xlu2 %338 }
  0xc7   : > { %v344_v6 = vsel %vm1880_vm3, %v343_v2, %v295_v0  ;;  %v1587_v0 = vld [vmem:[%s1283_s15 + $0x2c] sm:$0x1] }
  0xc8   : > { %v345_v8 = vsel %vm1879_vm4, %v344_v6, %v299_v63  ;;  %v1584_v63 = vld [vmem:[%s1283_s15 + $0x2d] sm:$0x1] }
  0xc9   : > { %v346_v13 = vsel %vm261_vm5, %v345_v8, %v303_v51 }
  0xcb   : > { %545 = vrot.lane.b32.xlu1 %v1461_v3, %s1182_s18 }
  0xcc   : > { %541 = vrot.lane.b32.xlu0 %v1464_v4, %s1183_s22  ;;  %549 = vrot.lane.b32.xlu2 %v1472_v7, %s1185_s24 }
  0xcd   : > { %v311_v10 = vpop.permute.xlu1 %310 }
  0xce   : > { %v307_v11 = vpop.permute.xlu0 %306  ;;  %v1488_v18 = vpop.permute.xlu2 %374 }
  0xcf   : > { %v347_v14 = vsel %vm1881_vm6, %v346_v13, %v307_v11 }
  0xd0   : > { %v348_v20 = vsel %vm265_vm7, %v347_v14, %v311_v10  ;;  %v1604_v10 = vld [vmem:[%s1283_s15 + $0x2f] sm:$0x1] }
  0xd1   : > { %v349_v26 = vsel %vm1877_vm8, %v348_v20, %v315_v54  ;;  %v1567_v54 = vld [vmem:[%s1283_s15 + $0x2a] sm:$0x1]  ;;  %v1619_v20 = vld [vmem:[%s1283_s15 + $0x3a] sm:$0x1] }
  0xd3   : > { %557 = vrot.lane.b32.xlu1 %v1483_v15, %s1186_s25 }
  0xd4   : > { %553 = vrot.lane.b32.xlu0 %v1486_v17, %s1187_s26  ;;  %561 = vrot.lane.b32.xlu2 %v1497_v21, %s1188_s27 }
  0xd5   : > { %v323_v24 = vpop.permute.xlu1 %322 }
  0xd6   : > { %v319_v25 = vpop.permute.xlu0 %318  ;;  %v1514_v31 = vpop.permute.xlu2 %383 }
  0xd7   : > { %v350_v27 = vsel %vm1878_vm9, %v349_v26, %v319_v25  ;;  %v1633_v26 = vld [vmem:[%s1283_s15 + $0x3e] sm:$0x1] }
  0xd8   : > { %v351_v32 = vsel %vm271_vm10, %v350_v27, %v323_v24  ;;  %v1636_v27 = vld [vmem:[%s1283_s15 + $0x3d] sm:$0x1] }
  0xd9   : > { %v352_v36 = vsel %vm273_vm11, %v351_v32, %v327_v59  ;;  %v1579_v59 = vld [vmem:[%s1283_s15 + $0x2b] sm:$0x1]  ;;  %v1643_v32 = vld [vmem:[%s1283_s15 + $0x3f] sm:$0x1] }
  0xdb   : > { %569 = vrot.lane.b32.xlu1 %v1509_v29, %s1189_s28 }
  0xdc   : > { %565 = vrot.lane.b32.xlu0 %v1512_v30, %s1190_s29  ;;  %573 = vrot.lane.b32.xlu2 %v1524_v34, %s1191_s30 }
  0xdd   : > { %v335_v38 = vpop.permute.xlu1 %334 }
  0xde   : > { %v331_v39 = vpop.permute.xlu0 %330  ;;  %v1543_v47 = vpop.permute.xlu2 %392 }
  0xdf   : > { %v353_v37 = vsel %vm1876_vm12, %v352_v36, %v331_v39  ;;  %vm1545_vm12 = vcmp.lt.s32.totalorder %v362_v40, 256 }
  0xe0   : > { %v354_v42 = vsel %vm277_vm13, %v353_v37, %v335_v38  ;;  %v1650_v38 = vld [vmem:[%s1283_s15 + $0x8] sm:$0x1] }
  0xe1   : > { %v355_v43 = vsel %vm279_vm14, %v354_v42, %v339_v5  ;;  %v1596_v5 = vld [vmem:[%s1283_s15 + $0x2e] sm:$0x1] }
  0xe2   : > { %v358_v49 = vrot.slane %v355_v43, 7 }
  0xe3   : > { %581 = vrot.lane.b32.xlu1 %v1538_v45, %s1192_s2 }
  0xe4   : > { %v360_v51 = vsel %vm359_vm15, %v280_v50, %v358_v49  ;;  %577 = vrot.lane.b32.xlu0 %v1541_v46, %s1193_s3  ;;  %585 = vrot.lane.b32.xlu2 %v1557_v52, %s1194_s4 }
  0xe5   : > { %366 = vst.msk [vmem:[%s1559_s13] ss:$4 sm:$0x3] %vm1545_vm12, %v360_v51  ;;  %v372_v53 = vpop.permute.xlu1 %371 }
  0xe6   : > { %v369_v44 = vpop.permute.xlu0 %368  ;;  %v1572_v56 = vpop.permute.xlu2 %401 }
  0xe7   : > { %v413_v36 = vsel %vm251_vm0, %v369_v44, %v1293_v1 }
  0xe8   : > { %v414_v37 = vsel %vm253_vm1, %v413_v36, %v372_v53 }
  0xe9   : > { %v415_v1 = vsel %vm255_vm2, %v414_v37, %v1488_v18 }
  0xeb   : > { %608 = vrot.lane.b32.xlu1 %v1567_v54, %s1184_s23 }
  0xec   : > { %604 = vrot.lane.b32.xlu0 %v1570_v55, %s1181_s17  ;;  %612 = vrot.lane.b32.xlu2 %v1579_v59, %s1180_s16 }
  0xed   : > { %v381_v60 = vpop.permute.xlu1 %380 }
  0xee   : > { %v378_v62 = vpop.permute.xlu0 %377  ;;  %v1589_v2 = vpop.permute.xlu2 %410 }
  0xf3   : > { %620 = vrot.lane.b32.xlu1 %v1584_v63, %s1182_s18 }
  0xf4   : > { %616 = vrot.lane.b32.xlu0 %v1587_v0, %s1183_s22  ;;  %624 = vrot.lane.b32.xlu2 %v1596_v5, %s1185_s24 }
  0xf5   : > { %v390_v6 = vpop.permute.xlu1 %389 }
  0xf6   : > { %v387_v8 = vpop.permute.xlu0 %386  ;;  %v436_v11 = vpop.permute.xlu2 %435 }
  0xfb   : > { %632 = vrot.lane.b32.xlu1 %v1601_v9, %s1186_s25 }
  0xfc   : > { %628 = vrot.lane.b32.xlu0 %v1604_v10, %s1187_s26  ;;  %636 = vrot.lane.b32.xlu2 %v1611_v12, %s1188_s27 }
  0xfd   : > { %v399_v13 = vpop.permute.xlu1 %398 }
  0xfe   : > { %v396_v14 = vpop.permute.xlu0 %395  ;;  %v445_v22 = vpop.permute.xlu2 %444 }
 0x103   : > { %644 = vrot.lane.b32.xlu1 %v1616_v19, %s1189_s28 }
 0x104   : > { %640 = vrot.lane.b32.xlu0 %v1619_v20, %s1190_s29  ;;  %648 = vrot.lane.b32.xlu2 %v1626_v23, %s1191_s30 }
 0x105   : > { %v1628_v24 = vpop.permute.xlu1 %407 }
 0x106   : > { %v405_v25 = vpop.permute.xlu0 %404  ;;  %v454_v28 = vpop.permute.xlu2 %453 }
 0x10b   : > { %656 = vrot.lane.b32.xlu1 %v1633_v26, %s1192_s2 }
 0x10c   : > { %652 = vrot.lane.b32.xlu0 %v1636_v27, %s1193_s3  ;;  %660 = vrot.lane.b32.xlu2 %v1643_v32, %s1194_s4 }
 0x10d   : > { %v433_v33 = vpop.permute.xlu1 %432 }
 0x10e   : > { %v430_v35 = vpop.permute.xlu0 %429  ;;  %v463_v39 = vpop.permute.xlu2 %462 }
 0x10f   : > { %v474_v40 = vsel %vm251_vm0, %v430_v35, %v1345_v16  ;;  %v416_v16 = vsel %vm1880_vm3, %v415_v1, %v378_v62 }
 0x110   : > { %v475_v41 = vsel %vm253_vm1, %v474_v40, %v433_v33  ;;  %v417_v51 = vsel %vm1879_vm4, %v416_v16, %v381_v60 }
 0x111   : > { %v476_v49 = vsel %vm255_vm2, %v475_v41, %v436_v11 }
 0x113   : > { %689 = vrot.lane.b32.xlu1 %v1443_v57, %s1181_s17 }
 0x114   : > { %686 = vrot.lane.b32.xlu0 %v1650_v38, %s1194_s4  ;;  %692 = vrot.lane.b32.xlu2 %v1454_v61, %s1184_s23  ;;  %v418_v61 = vsel %vm261_vm5, %v417_v51, %v1514_v31 }
 0x115   : > { %v442_v42 = vpop.permute.xlu1 %441  ;;  %v419_v62 = vsel %vm1881_vm6, %v418_v61, %v387_v8 }
 0x116   : > { %v439_v43 = vpop.permute.xlu0 %438  ;;  %v472_v50 = vpop.permute.xlu2 %471 }
 0x117   : > { %v477_v57 = vsel %vm1880_vm3, %v476_v49, %v439_v43 }
 0x118   : > { %v478_v18 = vsel %vm1879_vm4, %v477_v57, %v442_v42 }
 0x119   : > { %v479_v60 = vsel %vm261_vm5, %v478_v18, %v445_v22 }
 0x11b   : > { %698 = vrot.lane.b32.xlu1 %v1461_v3, %s1183_s22 }
 0x11c   : > { %695 = vrot.lane.b32.xlu0 %v1464_v4, %s1180_s16  ;;  %701 = vrot.lane.b32.xlu2 %v1472_v7, %s1182_s18  ;;  %v420_v4 = vsel %vm265_vm7, %v419_v62, %v390_v6 }
 0x11d   : > { %v451_v53 = vpop.permute.xlu1 %450  ;;  %v421_v7 = vsel %vm1877_vm8, %v420_v4, %v1543_v47 }
 0x11e   : > { %v448_v44 = vpop.permute.xlu0 %447  ;;  %v1680_v3 = vpop.permute.xlu2 %537  ;;  %v422_v31 = vsel %vm1878_vm9, %v421_v7, %v396_v14  ;;  %v960_v14 = vld [vmem:[%s1283_s15 + $0x28] sm:$0x1]  ;;  %s984_s15 = sshll.u32 %s1168_s9, 3  ;;  %s830_s9 = sshll.u32 %s1559_s13, 4  ;;  %s831_s9 = int_to_ptr.vmem [resolvable:$true] %s830_s9 }
 0x11f   : > { %v480_v11 = vsel %vm1881_vm6, %v479_v60, %v448_v44  ;;  %v423_v36 = vsel %vm271_vm10, %v422_v31, %v399_v13 }
 0x120   : > { %v481_v33 = vsel %vm265_vm7, %v480_v11, %v451_v53  ;;  %v424_v47 = vsel %vm273_vm11, %v423_v36, %v1572_v56 }
 0x121   : > { %v482_v35 = vsel %vm1877_vm8, %v481_v33, %v454_v28  ;;  %vm1888_vm8 = vcmask 850944  }
 0x123   : > { %707 = vrot.lane.b32.xlu1 %v1483_v15, %s1187_s26 }
 0x124   : > { %704 = vrot.lane.b32.xlu0 %v1486_v17, %s1185_s24  ;;  %710 = vrot.lane.b32.xlu2 %v1497_v21, %s1186_s25  ;;  %v425_v21 = vsel %vm1888_vm8, %v424_v47, %v405_v25 }
 0x125   : > { %v460_v8 = vpop.permute.xlu1 %459  ;;  %v426_v56 = vsel %vm277_vm13, %v425_v21, %v1628_v24 }
 0x126   : > { %v457_v22 = vpop.permute.xlu0 %456  ;;  %v1696_v15 = vpop.permute.xlu2 %549  ;;  %v427_v25 = vsel %vm279_vm14, %v426_v56, %v1589_v2 }
 0x127   : > { %v483_v6 = vsel %vm1878_vm9, %v482_v35, %v457_v22  ;;  %vm1889_vm9 = vmmov %vm1888_vm8  ;;  %vm1890_vm8 = vcmask 588800  }
 0x128   : > { %v484_v17 = vsel %vm271_vm10, %v483_v6, %v460_v8 }
 0x129   : > { %v485_v28 = vsel %vm273_vm11, %v484_v17, %v463_v39 }
 0x12b   : > { %716 = vrot.lane.b32.xlu1 %v1509_v29, %s1190_s29 }
 0x12c   : > { %713 = vrot.lane.b32.xlu0 %v1512_v30, %s1188_s27  ;;  %747 = vrot.lane.b32.xlu2 %v960_v14, %s1194_s4 }
 0x12d   : > { %v469_v13 = vpop.permute.xlu1 %468 }
 0x12e   : > { %v466_v40 = vpop.permute.xlu0 %465  ;;  %v1714_v30 = vpop.permute.xlu2 %561 }
 0x12f   : > { %v486_v37 = vsel %vm1889_vm9, %v485_v28, %v466_v40  ;;  %vm1891_vm9 = vcmask 654336  }
 0x130   : > { %v487_v29 = vsel %vm277_vm13, %v486_v37, %v469_v13 }
 0x131   : > { %v488_v41 = vsel %vm279_vm14, %v487_v29, %v472_v50 }
 0x132   : > { %v491_v42 = vrot.slane %v488_v41, 7 }
 0x133   : > { %753 = vrot.lane.b32.xlu1 %v1579_v59, %s1184_s23  ;;  %s815_s23 = scalar_lea.sflag [#allocation4], %s1279_s5 }
 0x134   : > { %v492_v39 = vsel %vm359_vm15, %v427_v25, %v491_v42  ;;  %750 = vrot.lane.b32.xlu0 %v1567_v54, %s1181_s17  ;;  %756 = vrot.lane.b32.xlu2 %v1587_v0, %s1180_s16 }
 0x135   : > { %951 = vst.msk [vmem:[%s1559_s13 + $0x1] ss:$4 sm:$0x3] %vm1545_vm12, %v492_v39  ;;  %v534_v24 = vpop.permute.xlu1 %533 }
 0x136   : > { %v530_v43 = vpop.permute.xlu0 %529  ;;  %v574_v1 = vpop.permute.xlu2 %573 }
 0x13b   : > { %762 = vrot.lane.b32.xlu1 %v1596_v5, %s1182_s18  ;;  %s828_s18 = scalar_lea.hbm %s1875_s1, %s984_s15 }
 0x13c   : > { %759 = vrot.lane.b32.xlu0 %v1584_v63, %s1183_s22  ;;  %765 = vrot.lane.b32.xlu2 %v1604_v10, %s1185_s24  ;;  %s832_s22 = sshll.u32 %s828_s18, 4  ;;  %s833_s22 = int_to_ptr.hbm [resolvable:$true] %s832_s22 }
 0x13d   : > { %v546_v2 = vpop.permute.xlu1 %545  ;;  %s1108_s24 = sshra.s32 %s833_s22, 4  ;;  %s1109_s24 = int_to_ptr.hbm [resolvable:$true] %s1108_s24 }
 0x13e   : > { %v542_v59 = vpop.permute.xlu0 %541  ;;  %v1734_v54 = vpop.permute.xlu2 %585  ;;  %p1115_p7 = scmp.lt.s32.totalorder %s1109_s24, %s1875_s1 }
 0x143   : > { %771 = vrot.lane.b32.xlu1 %v1611_v12, %s1186_s25  ;;  %s1110_s25 = scalar_lea.hbm %s1109_s24, 8 }
 0x144   : > { %768 = vrot.lane.b32.xlu0 %v1601_v9, %s1187_s26  ;;  %774 = vrot.lane.b32.xlu2 %v1619_v20, %s1188_s27  ;;  %p1111_p4 = scmp.ne.s32.totalorder %s1109_s24, %s1110_s25 }
 0x145   : > { %v558_v0 = vpop.permute.xlu1 %557 }
 0x146   : > { %v554_v16 = vpop.permute.xlu0 %553  ;;  %v613_v5 = vpop.permute.xlu2 %612  ;;  %p1112_p5 = pnand %p1111_p4, %p1256_p9 }
 0x148   : > { %p1113_p6 = pneg %p1112_p5 }
 0x14b   : > { %780 = vrot.lane.b32.xlu1 %v1626_v23, %s1189_s28 }
 0x14c   : > { %777 = vrot.lane.b32.xlu0 %v1616_v19, %s1190_s29  ;;  %783 = vrot.lane.b32.xlu2 %v1636_v27, %s1191_s30 }
 0x14d   : > { %v570_v63 = vpop.permute.xlu1 %569 }
 0x14e   : > { %v566_v10 = vpop.permute.xlu0 %565  ;;  %v625_v12 = vpop.permute.xlu2 %624 }
 0x153   : > { %786 = vrot.lane.b32.xlu1 %v1633_v26, %s1193_s3 }
 0x154   : > { %719 = vrot.lane.b32.xlu0 %v1524_v34, %s1189_s28  ;;  %722 = vrot.lane.b32.xlu2 %v1541_v46, %s1191_s30  ;;  %v588_v34 = vsel %vm251_vm0, %v1650_v38, %v530_v43  ;;  %s1114_s28 = scalar_lea.hbm %s1875_s1, 16 }
 0x155   : > { %v582_v9 = vpop.permute.xlu1 %581  ;;  %v589_v46 = vsel %vm253_vm1, %v588_v34, %v534_v24  ;;  %p1116_p8 = scmp.lt.s32.totalorder %s1114_s28, %s1110_s25 }
 0x156   : > { %v578_v20 = vpop.permute.xlu0 %577  ;;  %v637_v23 = vpop.permute.xlu2 %636 }
 0x157   : > { %p1117_p10 = por %p1116_p8, %p1115_p7 }
 0x159   : > { %p1118_p13 = pnand %p1117_p10, %p1113_p6 }
 0x15b   : > { %725 = vrot.lane.b32.xlu1 %v1538_v45, %s1193_s3 }
 0x15c   : > { %789 = vrot.lane.b32.xlu0 %v1643_v32, %s1192_s2  ;;  %728 = vrot.lane.b32.xlu2 %v1557_v52, %s1192_s2  ;;  %v590_v32 = vsel %vm255_vm2, %v589_v46, %v1680_v3 }
 0x15d   : > { %v609_v19 = vpop.permute.xlu1 %608  ;;  %v591_v51 = vsel %vm1880_vm3, %v590_v32, %v542_v59 }
 0x15e   : > { %v605_v27 = vpop.permute.xlu0 %604  ;;  %v649_v26 = vpop.permute.xlu2 %648  ;;  %v592_v38 = vsel %vm1879_vm4, %v591_v51, %v546_v2 }
 0x15f   : > { %v663_v49 = vsel %vm251_vm0, %v960_v14, %v605_v27  ;;  %v593_v44 = vsel %vm261_vm5, %v592_v38, %v1696_v15 }
 0x160   : > { %v664_v50 = vsel %vm253_vm1, %v663_v49, %v609_v19  ;;  %v594_v11 = vsel %vm1881_vm6, %v593_v44, %v554_v16 }
 0x161   : > { %v665_v18 = vsel %vm255_vm2, %v664_v50, %v613_v5  ;;  %v595_v33 = vsel %vm265_vm7, %v594_v11, %v558_v0 }
 0x162   : > { %v596_v8 = vsel %vm1890_vm8, %v595_v33, %v1714_v30 }
 0x163   : > { %v597_v22 = vsel %vm1891_vm9, %v596_v8, %v566_v10 }
 0x164   : > { %v598_v17 = vsel %vm271_vm10, %v597_v22, %v570_v63 }
 0x165   : > { %v621_v57 = vpop.permute.xlu1 %620  ;;  %v599_v14 = vsel %vm273_vm11, %v598_v17, %v574_v1 }
 0x166   : > { %v617_v45 = vpop.permute.xlu0 %616  ;;  %v661_v52 = vpop.permute.xlu2 %660 }
 0x167   : > { %v666_v61 = vsel %vm1880_vm3, %v665_v18, %v617_v45  ;;  %vm1893_vm3 = vmmov %vm1891_vm9 }
 0x168   : > { %v667_v53 = vsel %vm1879_vm4, %v666_v61, %v621_v57  ;;  %vm1892_vm4 = vmmov %vm1890_vm8 }
 0x169   : > { %v668_v3 = vsel %vm261_vm5, %v667_v53, %v625_v12 }
 0x16d   : > { %v633_v62 = vpop.permute.xlu1 %632 }
 0x16e   : > { %v629_v60 = vpop.permute.xlu0 %628  ;;  %v693_v7 = vpop.permute.xlu2 %692 }
 0x16f   : > { %v669_v4 = vsel %vm1881_vm6, %v668_v3, %v629_v60  ;;  %vm1894_vm6 = vcmask 850944  }
 0x170   : > { %v670_v31 = vsel %vm265_vm7, %v669_v4, %v633_v62  ;;  %v600_v21 = vsel %vm1894_vm6, %v599_v14, %v578_v20  ;;  %vm1895_vm8 = vmmov %vm1894_vm6  ;;  %vm1898_vm6 = vcmask 326656  }
 0x171   : > { %v671_v36 = vsel %vm1892_vm4, %v670_v31, %v637_v23  ;;  %v601_v29 = vsel %vm277_vm13, %v600_v21, %v582_v9  ;;  %vm1899_vm9 = vmmov %vm1898_vm6 }
 0x172   : > { %v602_v25 = vsel %vm279_vm14, %v601_v29, %v1734_v54 }
 0x175   : > { %v645_v35 = vpop.permute.xlu1 %644 }
 0x176   : > { %v641_v6 = vpop.permute.xlu0 %640  ;;  %v702_v28 = vpop.permute.xlu2 %701 }
 0x177   : > { %v672_v15 = vsel %vm1893_vm3, %v671_v36, %v641_v6  ;;  %vm1896_vm3 = vcmask 261120  }
 0x178   : > { %v673_v47 = vsel %vm271_vm10, %v672_v15, %v645_v35  ;;  %vm1897_vm4 = vmmov %vm1896_vm3 }
 0x179   : > { %v674_v13 = vsel %vm273_vm11, %v673_v47, %v649_v26 }
 0x17d   : > { %v657_v40 = vpop.permute.xlu1 %656 }
 0x17e   : > { %v653_v37 = vpop.permute.xlu0 %652  ;;  %v711_v1 = vpop.permute.xlu2 %710 }
 0x17f   : > { %v675_v56 = vsel %vm1895_vm8, %v674_v13, %v653_v37 }
 0x180   : > { %v676_v41 = vsel %vm277_vm13, %v675_v56, %v657_v40 }
 0x181   : > { %v677_v30 = vsel %vm279_vm14, %v676_v41, %v661_v52 }
 0x182   : > { %v680_v42 = vrot.slane %v677_v30, 7 }
 0x184   : > { %v681_v39 = vsel %vm359_vm15, %v602_v25, %v680_v42 }
 0x185   : > { %976 = vst.msk [vmem:[%s1559_s13 + $0x2] ss:$4 sm:$0x3] %vm1545_vm12, %v681_v39  ;;  %v690_v24 = vpop.permute.xlu1 %689 }
 0x186   : > { %v687_v43 = vpop.permute.xlu0 %686  ;;  %v748_v0 = vpop.permute.xlu2 %747 }
 0x187   : > { %v792_v34 = vsel %vm251_vm0, %v748_v0, %v1570_v55  ;;  %v731_v26 = vsel %vm251_vm0, %v687_v43, %v1446_v58  ;;  %vm1900_vm0 = vcmask 457728  }
 0x188   : > { %v732_v46 = vsel %vm253_vm1, %v731_v26, %v690_v24 }
 0x189   : > { %v733_v32 = vsel %vm255_vm2, %v732_v46, %v693_v7 }
 0x18d   : > { %v699_v2 = vpop.permute.xlu1 %698 }
 0x18e   : > { %v696_v59 = vpop.permute.xlu0 %695  ;;  %v757_v63 = vpop.permute.xlu2 %756 }
 0x18f   : > { %v734_v18 = vsel %vm1897_vm4, %v733_v32, %v696_v59 }
 0x190   : > { %v735_v61 = vsel %vm1899_vm9, %v734_v18, %v699_v2 }
 0x191   : > { %v736_v44 = vsel %vm261_vm5, %v735_v61, %v702_v28 }
 0x195   : > { %v708_v16 = vpop.permute.xlu1 %707 }
 0x196   : > { %v705_v5 = vpop.permute.xlu0 %704  ;;  %v766_v9 = vpop.permute.xlu2 %765 }
 0x19d   : > { %v717_v10 = vpop.permute.xlu1 %716 }
 0x19e   : > { %v714_v12 = vpop.permute.xlu0 %713  ;;  %v775_v27 = vpop.permute.xlu2 %774 }
 0x1a5   : > { %v754_v20 = vpop.permute.xlu1 %753 }
 0x1a6   : > { %v751_v23 = vpop.permute.xlu0 %750  ;;  %v784_v55 = vpop.permute.xlu2 %783 }
 0x1a7   : > { %v793_v49 = vsel %vm253_vm1, %v792_v34, %v751_v23  ;;  %vm1901_vm1 = vmmov %vm1900_vm0 }
 0x1a8   : > { %v794_v50 = vsel %vm255_vm2, %v793_v49, %v754_v20  ;;  %v737_v60 = vsel %vm1901_vm1, %v736_v44, %v705_v5  ;;  %vm1902_vm2 = vcmask 588800  }
 0x1a9   : > { %v795_v51 = vsel %vm1896_vm3, %v794_v50, %v757_v63  ;;  %v738_v3 = vsel %vm265_vm7, %v737_v60, %v708_v16  ;;  %vm1903_vm8 = vmmov %vm1902_vm2  ;;  %vm1904_vm3 = vcmask 654336  }
 0x1aa   : > { %v739_v7 = vsel %vm1903_vm8, %v738_v3, %v711_v1  ;;  %vm1905_vm4 = vmmov %vm1904_vm3 }
 0x1ab   : > { %v740_v35 = vsel %vm1905_vm4, %v739_v7, %v714_v12 }
 0x1ac   : > { %v741_v15 = vsel %vm271_vm10, %v740_v35, %v717_v10 }
 0x1ad   : > { %v763_v54 = vpop.permute.xlu1 %762 }
 0x1ae   : > { %v760_v19 = vpop.permute.xlu0 %759  ;;  %v723_v33 = vpop.permute.xlu2 %722 }
 0x1af   : > { %v796_v52 = vsel %vm1898_vm6, %v795_v51, %v760_v19 }
 0x1b0   : > { %v797_v58 = vsel %vm261_vm5, %v796_v52, %v763_v54  ;;  %vm1906_vm5 = vcmask 850944  }
 0x1b1   : > { %v798_v62 = vsel %vm1900_vm0, %v797_v58, %v766_v9 }
 0x1b5   : > { %v772_v57 = vpop.permute.xlu1 %771 }
 0x1b6   : > { %v769_v45 = vpop.permute.xlu0 %768  ;;  %v729_v14 = vpop.permute.xlu2 %728 }
 0x1b7   : > { %v799_v11 = vsel %vm265_vm7, %v798_v62, %v769_v45  ;;  %vm1907_vm7 = vmmov %vm1906_vm5 }
 0x1b8   : > { %v800_v4 = vsel %vm1902_vm2, %v799_v11, %v772_v57 }
 0x1b9   : > { %v801_v31 = vsel %vm1904_vm3, %v800_v4, %v775_v27 }
 0x1bd   : > { %v781_v38 = vpop.permute.xlu1 %780 }
 0x1be   : > { %v778_v53 = vpop.permute.xlu0 %777 }
 0x1bf   : > { %v802_v6 = vsel %vm271_vm10, %v801_v31, %v778_v53 }
 0x1c0   : > { %v803_v36 = vsel %vm273_vm11, %v802_v6, %v781_v38 }
 0x1c1   : > { %v804_v47 = vsel %vm1906_vm5, %v803_v36, %v784_v55 }
 0x1c5   : > { %v787_v8 = vpop.permute.xlu1 %786 }
 0x1c6   : > { %v720_v22 = vpop.permute.xlu0 %719  ;;  %v805_v21 = vsel %vm277_vm13, %v804_v47, %v787_v8 }
 0x1c7   : > { %v742_v17 = vsel %vm273_vm11, %v741_v15, %v720_v22 }
 0x1c8   : > { %v743_v28 = vsel %vm1907_vm7, %v742_v17, %v723_v33 }
 0x1cd   : > { %v726_v13 = vpop.permute.xlu1 %725 }
 0x1ce   : > { %v790_v40 = vpop.permute.xlu0 %789  ;;  %v744_v37 = vsel %vm277_vm13, %v743_v28, %v726_v13 }
 0x1cf   : > { %v806_v56 = vsel %vm279_vm14, %v805_v21, %v790_v40  ;;  %v745_v41 = vsel %vm279_vm14, %v744_v37, %v729_v14 }
 0x1d0   : > { %v809_v29 = vrot.slane %v806_v56, 7 }
 0x1d2   : > { %v810_v30 = vsel %vm359_vm15, %v745_v41, %v809_v29 }
 0x1d3   : > { %977 = vst.msk [vmem:[%s1559_s13 + $0x3] ss:$4 sm:$0x3] %vm1545_vm12, %v810_v30 }
 0x1d4   : > { %1121 = shalt.err (!%p1118_p13)
}
 0x1d5   : > { %987 = dma.vmem_to_hbm [thread:$0]  (%p1256_p9), %s831_s9, 128, %s833_s22, %s815_s23  }
 0x1d6 PF: > { %s844_s5 = sand.u32 1, %s1156_s6   ;;  %p994_p0 = pnand %p920_p12, %p1263_p11 }
 0x1d7   : > { %s845_s2 = scalar_lea.sflag [#allocation4], %s844_s5 }
 0x1d8   : > { %p995_p1 = pneg %p994_p0 }
 0x1da   : > { %1151 = dma.done.wait (%p995_p1), %s845_s2, 128  }
 0x1db   : > { %1153 = vsyncadd (%p995_p1), %s845_s2, 4294967168  ;;  %s17_s11 = sadd.s32 1, %s1176_s11   ;;  %s1908_s6 = smov %s1160_s7 }
 0x1dc   : > { %p14_p2 = scmp.ge.s32.totalorder %s17_s11, 4   ;;  %s1909_s7 = smov %s1164_s8 }
 0x1dd   : > { %s1910_s8 = smov %s1261_s20  ;;  %s1911_s9 = smov %s1172_s10 }
 0x1de   : > { %s1912_s10 = smov %s1914_s14  ;;  %16 = sbr.rel (!%p14_p2) target bundleno = 6 (0x6), region = 75 }
 0x1e3   :  { %851 = vsyncpa [#allocation3], 1 }
 0x1e4   :  { %853 = vsyncpa [#allocation3 + $0x1], 1 }
 0x1e5   :  { %854 = vsyncpa [#allocation4], 1 }
 0x1e6   :  { %856 = vsyncpa [#allocation4 + $0x1], 1 }

// kernel: tpu_custom_call.1
= control target key start
LH: loop header
LB: loop body
LE: loop exit
PB: predicated region body
PF: predicated region fallthrough
CT: control target
= control target key end

     0   :  { %6 = vsyncpa [#allocation3], 0  ;;  %s712_s0 = inlined_call_operand.hbm [shape: f32[2,4,16,16], index: 0, kind: input, shape index: {}]   ;;  %s713_s1 = inlined_call_operand.hbm [shape: f32[2,4,4,8,8], index: 1, kind: output, shape index: {}]  }
   0x1   :  { %8 = vsyncpa [#allocation3 + $0x1], 0 }
   0x2   :  { %9 = vsyncpa [#allocation4], 0 }
   0x3   :  { %11 = vsyncpa [#allocation4 + $0x1], 0  ;;  %s556_s6 = smov 0   ;;  %s558_s7 = smov 0  }
   0x4   :  { %s560_s8 = smov 0   ;;  %s562_s9 = smov 0  }
   0x5   :  { %s564_s10 = smov 0   ;;  %s566_s11 = smov 0  }
   0x6 LB: > { %s331_s12 = sadd.s32 4294967295, %s539_s11   ;;  %s332_s13 = sadd.s32 4294967294, %s539_s11   ;;  %s539_s11 = sphi %s566_s11, %s17_s11   ;;  %s535_s10 = sphi %s564_s10, %s722_s10   ;;  %s531_s9 = sphi %s562_s9, %s721_s9   ;;  %s527_s8 = sphi %s560_s8, %s720_s8   ;;  %s523_s7 = sphi %s558_s7, %s719_s7   ;;  %s519_s6 = sphi %s556_s6, %s718_s6  }
   0x7   : > { %s29_s14 = sadd.s32 1, %s535_s10  ;;  %s38_s15 = sadd.s32 1, %s527_s8 }
   0x8   : > { %p31_p0 = scmp.ge.s32.totalorder %s29_s14, 2  ;;  %p45_p1 = scmp.ne.s32.totalorder %s527_s8, %s523_s7 }
   0x9   : > { %p46_p2 = scmp.eq.s32.totalorder %s539_s11, 0  ;;  %p51_p3 = scmp.ne.s32.totalorder %s523_s7, %s519_s6 }
   0xa   : > { %s724_s14 = smov (%p31_p0, %s29_s14), 0  ;;  %p52_p5 = scmp.eq.s32.totalorder %s331_s12, 0 }
   0xb   : > { %p597_p4 = por %p46_p2, %p45_p1  ;;  %s33_s17 = ssub.s32 %s535_s10, %s724_s14 }
   0xc   : > { %p77_p6 = scmp.eq.s32.totalorder %s331_s12, 1  ;;  %p36_p7 = scmp.eq.s32.totalorder %s33_s17, 0 }
   0xd   : > { %p603_p8 = por %p52_p5, %p51_p3  ;;  %p83_p10 = scmp.eq.s32.totalorder %s332_s13, 1 }
   0xe   : > { %p607_p9 = por %p77_p6, %p45_p1  ;;  %p334_p12 = scmp.ge.s32.totalorder %s539_s11, 2 }
   0xf   : > { %s612_s20 = scalar_select %p36_p7, %s527_s8, %s38_s15  }
  0x10   : > { %p614_p11 = por %p83_p10, %p51_p3  ;;  %p372_p13 = scmp.lt.s32.totalorder %s539_s11, 2 }
  0x11   : > { %s103_s22 = sand.u32 1, %s527_s8   ;;  %s358_s24 = sshll.u32 %s535_s10, 6 }
  0x12   : > { %s335_s23 = sshll.u32 %s103_s22, 6  ;;  %s114_s27 = scalar_lea.hbm %s712_s0, %s358_s24 }
  0x13   : > { %s107_s28 = scalar_lea.vmem [#allocation2], %s335_s23  ;;  %s115_s30 = sshll.u32 %s114_s27, 4  ;;  %s116_s30 = int_to_ptr.hbm [resolvable:$true] %s115_s30 }
  0x14   : > { %s117_s29 = sshll.u32 %s107_s28, 4  ;;  %p365_p0 = pnand %p372_p13, %p597_p4  ;;  %s118_s29 = int_to_ptr.vmem [resolvable:$true] %s117_s29 }
  0x15   : > { %p338_p1 = scmp.ge.s32.totalorder %s539_s11, 1  ;;  %s104_s2 = scalar_lea.sflag [#allocation3], %s103_s22 }
  0x16   : > { %s541_s3 = smov 128   ;;  %s542_s4 = smov 8  }
  0x17   : > { %367 = dma.hbm_to_vmem [thread:$0]  (!%p365_p0), %s116_s30, 1024, %s118_s29, %s104_s2, %s541_s3, %s541_s3, %s542_s4  }
  0x18   : > { %p125_p2 = scmp.lt.s32.totalorder %s539_s11, 3 }
  0x1a   : > { %p126_p3 = pnand %p338_p1, %p125_p2 }
  0x1b   : > { %s630_s5 = sand.u32 (!%p126_p3), 1, %s523_s7  }
  0x1c   : > { %129 = sbr.rel (%p126_p3) target bundleno = 171 (0xab), region = 24  ;;  %s339_s12 = sshll.u32 (!%p126_p3), %s630_s5, 6 }
  0x1d   : > { %s132_s13 = scalar_lea.sflag (!%p126_p3), [#allocation3], %s630_s5  ;;  %s135_s15 = scalar_lea.vmem (!%p126_p3), [#allocation2], %s339_s12 }
  0x21   : > { %510 = dma.done.wait (%p603_p8), %s132_s13, 1024  }
  0x22   : > { %512 = vsyncadd (%p603_p8), %s132_s13, 4294966272  ;;  %s340_s16 = sshll.u32 %s630_s5, 7  ;;  %v168_v0 = vld [vmem:[%s135_s15 + $0x20] sm:$0xff]  ;;  %s543_s17 = smov 120   ;;  %vm161_vm0 = vcmask 64512   ;;  %v167_v2 = vld [vmem:[%s135_s15 + $0x10] sm:$0xff] }
  0x23   : > { %v166_v1 = vld [vmem:[%s135_s15] sm:$0xff]  ;;  %178 = vrot.lane.b32.xlu1 %v168_v0, %s543_s17  ;;  %v200_v3 = vld [vmem:[%s135_s15 + $0x8] sm:$0xff]  ;;  %s639_s22 = scalar_lea.vmem [#allocation5], %s340_s16  ;;  %v169_v4 = vld [vmem:[%s135_s15 + $0x30] sm:$0xff]  ;;  %s359_s18 = sshll.u32 %s531_s9, 7 }
  0x24   : > { %174 = vrot.lane.b32.xlu0 %v166_v1, %s543_s17  ;;  %162 = vst.msk [vmem:[%s639_s22] sm:$0xff] %vm161_vm0, %v166_v1  ;;  %208 = vrot.lane.b32.xlu2 %v200_v3, %s543_s17  ;;  %v201_v5 = vld [vmem:[%s135_s15 + $0x18] sm:$0xff]  ;;  %s240_s25 = scalar_lea.hbm %s713_s1, %s359_s18  ;;  %s241_s26 = sshll.u32 %s639_s22, 4  ;;  %s242_s26 = int_to_ptr.vmem [resolvable:$true] %s241_s26 }
  0x25   : > { %163 = vst.msk [vmem:[%s639_s22 + $0x8] sm:$0xff] %vm161_vm0, %v167_v2  ;;  %v202_v6 = vld [vmem:[%s135_s15 + $0x28] sm:$0xff]  ;;  %v203_v7 = vld [vmem:[%s135_s15 + $0x38] sm:$0xff]  ;;  %s243_s27 = sshll.u32 %s240_s25, 4  ;;  %s226_s9 = scalar_lea.sflag [#allocation4], %s630_s5  ;;  %s244_s27 = int_to_ptr.hbm [resolvable:$true] %s243_s27 }
  0x26   : > { %164 = vst.msk [vmem:[%s639_s22 + $0x10] sm:$0xff] %vm161_vm0, %v168_v0  ;;  %s471_s28 = sshra.s32 %s244_s27, 4  ;;  %s477_s3 = scalar_lea.hbm %s713_s1, 256  ;;  %s472_s28 = int_to_ptr.hbm [resolvable:$true] %s471_s28 }
  0x27   : > { %165 = vst.msk [vmem:[%s639_s22 + $0x18] sm:$0xff] %vm161_vm0, %v169_v4  ;;  %s473_s29 = scalar_lea.hbm %s472_s28, 128  ;;  %p478_p7 = scmp.lt.s32.totalorder %s472_s28, %s713_s1 }
  0x28   : > { %345 = vst.msk [vmem:[%s639_s22 + $0x40] sm:$0xff] %vm161_vm0, %v200_v3  ;;  %p474_p4 = scmp.ne.s32.totalorder %s472_s28, %s473_s29  ;;  %p479_p8 = scmp.lt.s32.totalorder %s477_s3, %s473_s29 }
  0x29   : > { %346 = vst.msk [vmem:[%s639_s22 + $0x48] sm:$0xff] %vm161_vm0, %v201_v5 }
  0x2a   : > { %347 = vst.msk [vmem:[%s639_s22 + $0x50] sm:$0xff] %vm161_vm0, %v202_v6  ;;  %p475_p5 = pnand %p474_p4, %p607_p9  ;;  %p480_p10 = por %p479_p8, %p478_p7 }
  0x2b   : > { %180 = vrot.lane.b32.xlu1 %v169_v4, %s543_s17  ;;  %348 = vst.msk [vmem:[%s639_s22 + $0x58] sm:$0xff] %vm161_vm0, %v203_v7 }
  0x2c   : > { %176 = vrot.lane.b32.xlu0 %v167_v2, %s543_s17  ;;  %210 = vrot.lane.b32.xlu2 %v201_v5, %s543_s17  ;;  %p476_p6 = pneg %p475_p5 }
  0x2e   : > { %p481_p13 = pnand %p480_p10, %p476_p6 }
  0x33   : > { %214 = vrot.lane.b32.xlu1 %v203_v7, %s543_s17 }
  0x34   : > { %212 = vrot.lane.b32.xlu0 %v202_v6, %s543_s17 }
  0x7e   : > { %v209_v8 = vpop.permute.xlu2 %208 }
  0x7f   : > { %349 = vst.msk [vmem:[%s639_s22 + $0x60] sm:$0xff] %vm161_vm0, %v209_v8 }
  0x86   : > { %v211_v9 = vpop.permute.xlu2 %210 }
  0x87   : > { %350 = vst.msk [vmem:[%s639_s22 + $0x68] sm:$0xff] %vm161_vm0, %v211_v9 }
  0x95   : > { %v179_v10 = vpop.permute.xlu1 %178 }
  0x96   : > { %v175_v11 = vpop.permute.xlu0 %174  ;;  %343 = vst.msk [vmem:[%s639_s22 + $0x30] sm:$0xff] %vm161_vm0, %v179_v10 }
  0x97   : > { %341 = vst.msk [vmem:[%s639_s22 + $0x20] sm:$0xff] %vm161_vm0, %v175_v11 }
  0x9d   : > { %v181_v12 = vpop.permute.xlu1 %180 }
  0x9e   : > { %v177_v13 = vpop.permute.xlu0 %176  ;;  %344 = vst.msk [vmem:[%s639_s22 + $0x38] sm:$0xff] %vm161_vm0, %v181_v12 }
  0x9f   : > { %342 = vst.msk [vmem:[%s639_s22 + $0x28] sm:$0xff] %vm161_vm0, %v177_v13 }
  0xa5   : > { %v215_v14 = vpop.permute.xlu1 %214 }
  0xa6   : > { %v213_v15 = vpop.permute.xlu0 %212  ;;  %352 = vst.msk [vmem:[%s639_s22 + $0x78] sm:$0xff] %vm161_vm0, %v215_v14 }
  0xa7   : > { %351 = vst.msk [vmem:[%s639_s22 + $0x70] sm:$0xff] %vm161_vm0, %v213_v15 }
  0xa8   : > { %484 = shalt.err (!%p481_p13)
}
  0xa9   : > { %s544_s5 = smov 128   ;;  %s545_s13 = smov 8  }
  0xaa   : > { %362 = dma.vmem_to_hbm [thread:$0]  (%p607_p9), %s242_s26, 2048, %s244_s27, %s226_s9, %s544_s5, %s544_s5, %s545_s13  }
  0xab PF: > { %s258_s15 = sand.u32 1, %s519_s6   ;;  %p369_p0 = pnand %p334_p12, %p614_p11 }
  0xac   : > { %s259_s16 = scalar_lea.sflag [#allocation4], %s258_s15 }
  0xad   : > { %p370_p1 = pneg %p369_p0 }
  0xaf   : > { %514 = dma.done.wait (%p370_p1), %s259_s16, 2048  }
  0xb0   : > { %516 = vsyncadd (%p370_p1), %s259_s16, 4294965248  ;;  %s17_s11 = sadd.s32 1, %s539_s11   ;;  %s718_s6 = smov %s523_s7 }
  0xb1   : > { %p14_p2 = scmp.ge.s32.totalorder %s17_s11, 4   ;;  %s719_s7 = smov %s527_s8 }
  0xb2   : > { %s720_s8 = smov %s612_s20  ;;  %s721_s9 = smov %s535_s10 }
  0xb3   : > { %s722_s10 = smov %s724_s14  ;;  %16 = sbr.rel (!%p14_p2) target bundleno = 6 (0x6), region = 72 }
  0xb8   :  { %265 = vsyncpa [#allocation3], 1 }
  0xb9   :  { %267 = vsyncpa [#allocation3 + $0x1], 1 }
  0xba   :  { %268 = vsyncpa [#allocation4], 1 }
  0xbb   :  { %270 = vsyncpa [#allocation4 + $0x1], 1 }

</bundles_post_ra>
